<compile_context>
chip_gen: v5e
topology: v5e:2x2
jax: 0.10.0
libtpu: 0.0.40
codegen_flags: <defaults>
</compile_context>

<pallas_src>
import numpy as np
import jax
import jax.numpy as jnp
from jax.experimental import pallas as pl
from jax.experimental.pallas import tpu as pltpu


# ----------------------------- Pallas kernel -------------------------------

def make_fused_gru_kernel(L: int, B: int, Dp: int):
    """Fused multi-expert GRU over L timesteps in a single grid step.

    Refs seen by the kernel:
      x_ref     [L*B, C*H]   inputs, time-major rows (row l*B + b), experts
                             concatenated along lanes
      valid_ref [L*B, 1]     1.0 for real tokens, 0.0 for (left) padding
      wih_ref   [C*H, 3*Dp]  block-diagonal W_ih^T, gates (r|z|n) along lanes
      whh_ref   [Dp,  3*Dp]  block-diagonal W_hh^T, gates (r|z|n) along lanes
      bi_ref    [1,   3*Dp]  b_ih with b_hh_r / b_hh_z folded in
      bhn_ref   [1,   Dp]    b_hh_n (must stay inside r * (h@W_hn + b_hn))
      o_ref     [B,  L*Dp]   hidden state per timestep, lane-dense
    """

    def kernel(x_ref, valid_ref, wih_ref, whh_ref, bi_ref, bhn_ref, o_ref):
        # 1) Hoisted input projection: ONE MXU matmul for all timesteps,
        #    batch rows, experts and gates (M = L*B, K = C*H, N = 3*Dp).
        gi = jnp.dot(x_ref[...], wih_ref[...],
                     preferred_element_type=jnp.float32) + bi_ref[...]

        # 2) Hoist loop-invariant operands off the serial critical path.
        whh = whh_ref[...]            # [Dp, 3*Dp]
        bhn = bhn_ref[...]            # [1, Dp]
        valid = valid_ref[...]        # [L*B, 1]

        # 3) Recurrence: ONE matmul + gate math per step for all B rows and
        #    all C experts at once.  Fully unrolled (L static & small here);
        #    for large L switch to lax.fori_loop(..., unroll=4..8) with h
        #    carried in a VMEM scratch to bound vreg pressure.
        h = jnp.zeros((B, Dp), jnp.float32)
        for t in range(L):
            row = t * B
            git = gi[row:row + B]                         # [B, 3*Dp]
            v = valid[row:row + B]                        # [B, 1]

            gh = jnp.dot(h, whh,
                         preferred_element_type=jnp.float32)  # [B, 3*Dp]

            r = jax.nn.sigmoid(git[:, 0 * Dp:1 * Dp] + gh[:, 0 * Dp:1 * Dp])
            z = jax.nn.sigmoid(git[:, 1 * Dp:2 * Dp] + gh[:, 1 * Dp:2 * Dp])
            n = jnp.tanh(git[:, 2 * Dp:3 * Dp]
                         + r * (gh[:, 2 * Dp:3 * Dp] + bhn))
            h_cand = (1.0 - z) * n + z * h

            # Left-padded inputs + h0 = 0  ->  padding rows keep h == 0, so
            # this gate reproduces roll -> GRU -> roll-back -> masked_fill.
            h = h + v * (h_cand - h)

            # Lane-dense, 128-aligned store: [B, Dp] slab at lane offset t*Dp.
            o_ref[:, t * Dp:(t + 1) * Dp] = h.astype(o_ref.dtype)

    return kernel


def gru_experts_fused(x, valid, wih_cat, whh_cat, bi_cat, bhn, *, B, L):
    """x: [L*B, C*H] time-major fused inputs; valid: [L*B, 1] f32.
       Returns hidden states as [B, L*Dp] (lane-dense; padded lanes are 0)."""
    CH = x.shape[1]
    Dp = whh_cat.shape[0]
    kernel = make_fused_gru_kernel(L, B, Dp)

    return pl.pallas_call(
        kernel,
        out_shape=jax.ShapeDtypeStruct((B, L * Dp), x.dtype),
        grid_spec=pltpu.PrefetchScalarGridSpec(
            num_scalar_prefetch=0,
            grid=(1,),   # experts fused -> a single serial chain of L steps
            in_specs=[
                pl.BlockSpec((L * B, CH), lambda i: (0, 0)),
                pl.BlockSpec((L * B, 1), lambda i: (0, 0)),
                pl.BlockSpec((CH, 3 * Dp), lambda i: (0, 0)),
                pl.BlockSpec((Dp, 3 * Dp), lambda i: (0, 0)),
                pl.BlockSpec((1, 3 * Dp), lambda i: (0, 0)),
                pl.BlockSpec((1, Dp), lambda i: (0, 0)),
            ],
            out_specs=pl.BlockSpec((B, L * Dp), lambda i: (0, 0)),
        ),
        compiler_params=pltpu.CompilerParams(
            dimension_semantics=("arbitrary",),
            # tiny footprint here; keep the limit modest so the config also
            # fits v7x's 64 MiB VMEM when L*B scales up.
            vmem_limit_bytes=32 * 1024 * 1024,
        ),
    )(x, valid, wih_cat, whh_cat, bi_cat, bhn)


# ------------------------------ JAX wrapper ----------------------------------

def gru_inference_layer_forward(fused_params, seqs, timeline_mask,
                                attention_mask=None):
    """seqs: [B, L, C, H]; timeline_mask: [B, L, 1] bool (True = padding,
       LEFT-padded as in the reference module).  attention_mask is accepted
       for parity with PyTorch but unused (as in the reference forward).
       Returns a list of C arrays, each [B, L, H]."""
    del attention_mask
    B, L, C, H = seqs.shape
    CH = C * H
    Dp = fused_params["whh_cat"].shape[0]

    # Validity gate (1.0 = real token); replaces roll / un-roll / masked_fill.
    # NOTE: only correct for LEFT-padded sequences (pad prefix), matching the
    # original module's usage.
    valid = jnp.transpose((~timeline_mask[:, :, 0]).astype(jnp.float32))  # [L, B]
    valid = valid.reshape(L * B, 1)

    # Single input layout pass: [B,L,C,H] -> time-major, expert-fused rows
    # [L*B, C*H] (row l*B + b).  In a bf16 build the dtype cast fuses here.
    x = jnp.transpose(seqs, (1, 0, 2, 3)).reshape(L * B, CH)

    y = gru_experts_fused(x, valid,
                          fused_params["wih_cat"], fused_params["whh_cat"],
                          fused_params["bi_cat"], fused_params["bhn"],
                          B=B, L=L)                      # [B, L*Dp]
    y = y.reshape(B, L, Dp)                              # free reshape (no transpose)
    return [y[:, :, i * H:(i + 1) * H] for i in range(C)]


# --------------------------- parameter preparation ---------------------------

def init_raw_params(key, C, H):
    """Deterministic synthetic parameters in PyTorch nn.GRU(H, H) layout:
       weight_ih_l0 / weight_hh_l0 are [3H, H] with gates stacked (r|z|n)."""
    k = 1.0 / np.sqrt(H)
    k0, k1, k2, k3 = jax.random.split(key, 4)
    return {
        "w_ih": jax.random.uniform(k0, (C, 3 * H, H), jnp.float32, -k, k),
        "w_hh": jax.random.uniform(k1, (C, 3 * H, H), jnp.float32, -k, k),
        "b_ih": jax.random.uniform(k2, (C, 3 * H), jnp.float32, -k, k),
        "b_hh": jax.random.uniform(k3, (C, 3 * H), jnp.float32, -k, k),
    }


def fuse_params(raw, C, H):
    """Build block-diagonal, gate-concatenated, lane-padded kernel operands.

       wih_cat [C*H, 3*Dp], whh_cat [Dp, 3*Dp], bi_cat [1, 3*Dp] (b_hh_r/z
       folded in), bhn [1, Dp] (b_hh_n kept separate).  Dp = C*H rounded up
       to a multiple of 128; padding rows/cols are zero so padded h lanes
       stay exactly 0."""
    CH = C * H
    Dp = ((CH + 127) // 128) * 128
    # For C*H much larger than a couple of lane tiles, tile experts over a
    # parallel grid axis instead of growing the block-diagonal further.
    assert CH <= 512, "expert fusion assumes a modest fused width C*H"

    w_ih = np.asarray(raw["w_ih"], np.float32)
    w_hh = np.asarray(raw["w_hh"], np.float32)
    b_ih = np.asarray(raw["b_ih"], np.float32)
    b_hh = np.asarray(raw["b_hh"], np.float32)

    wih_cat = np.zeros((CH, 3 * Dp), np.float32)
    whh_cat = np.zeros((Dp, 3 * Dp), np.float32)
    bi_cat = np.zeros((1, 3 * Dp), np.float32)
    bhn = np.zeros((1, Dp), np.float32)

    for c in range(C):
        r0, r1 = c * H, (c + 1) * H
        for g in range(3):                               # gate order r, z, n
            wg_ih = w_ih[c, g * H:(g + 1) * H, :]        # [H_out, H_in]
            wg_hh = w_hh[c, g * H:(g + 1) * H, :]
            c0 = g * Dp + c * H
            wih_cat[r0:r1, c0:c0 + H] = wg_ih.T          # input dim on rows
            whh_cat[r0:r1, c0:c0 + H] = wg_hh.T
            bi_cat[0, c0:c0 + H] = b_ih[c, g * H:(g + 1) * H]
            if g < 2:                                    # fold b_hh_r, b_hh_z
                bi_cat[0, c0:c0 + H] += b_hh[c, g * H:(g + 1) * H]
        bhn[0, r0:r1] = b_hh[c, 2 * H:3 * H]

    return {
        "wih_cat": jnp.asarray(wih_cat),
        "whh_cat": jnp.asarray(whh_cat),
        "bi_cat": jnp.asarray(bi_cat),
        "bhn": jnp.asarray(bhn),
    }


# --------------------------- pure-JAX reference ------------------------------

def roll_time(x, shift):
    """torch.roll(x, shift, dim=0) for a [L, ...] array with traced shift."""
    L = x.shape[0]
    idx = (jnp.arange(L) - shift) % L
    return jnp.take(x, idx, axis=0)


def _gru_ref(x, w_ih, w_hh, b_ih, b_hh):
    """x: [B, L, H]; w_*: [3H, H] PyTorch layout (gates r|z|n); b_*: [3H]."""
    B, L, H = x.shape
    wir, wiz, win = w_ih[:H], w_ih[H:2 * H], w_ih[2 * H:]
    whr, whz, whn = w_hh[:H], w_hh[H:2 * H], w_hh[2 * H:]
    bir, biz, b_in = b_ih[:H], b_ih[H:2 * H], b_ih[2 * H:]
    bhr, bhz, bhn = b_hh[:H], b_hh[H:2 * H], b_hh[2 * H:]

    def step(h, x_t):
        r = jax.nn.sigmoid(x_t @ wir.T + bir + h @ whr.T + bhr)
        z = jax.nn.sigmoid(x_t @ wiz.T + biz + h @ whz.T + bhz)
        n = jnp.tanh(x_t @ win.T + b_in + r * (h @ whn.T + bhn))
        h_new = (1.0 - z) * n + z * h
        return h_new, h_new

    _, ys = jax.lax.scan(step, jnp.zeros((B, H), jnp.float32),
                         jnp.transpose(x, (1, 0, 2)))
    return jnp.transpose(ys, (1, 0, 2))


def reference_forward(raw, seqs, timeline_mask):
    """Direct transcription of the PyTorch module (roll -> GRU -> roll -> mask)."""
    B, L, C, H = seqs.shape
    mask2d = timeline_mask[:, :, 0]
    length = jnp.sum(~mask2d, axis=1)
    zero_length = jnp.sum(mask2d, axis=1)
    outs = []
    for i in range(C):
        xi = jax.vmap(roll_time)(seqs[:, :, i, :], length)
        yi = _gru_ref(xi, raw["w_ih"][i], raw["w_hh"][i],
                      raw["b_ih"][i], raw["b_hh"][i])
        yi = jax.vmap(roll_time)(yi, zero_length)
        yi = jnp.where(timeline_mask, 0.0, yi)
        outs.append(yi)
    return outs


def _assert_left_padded(timeline_mask):
    """Host-side sanity check: padding must be a strict left prefix."""
    m = np.asarray(timeline_mask[:, :, 0]).astype(np.int32)
    assert np.all(np.diff(m, axis=1) <= 0), "timeline_mask must be left-padded"


# ---------------------------------- main -------------------------------------

if __name__ == "__main__":
    B, L, C, H = 2, 8, 3, 32   # batch, maxlen, num_context, hidden_units

    key = jax.random.PRNGKey(0)
    kp, kx = jax.random.split(key)
    raw_params = init_raw_params(kp, C, H)
    fused_params = fuse_params(raw_params, C, H)
    seqs = jax.random.normal(kx, (B, L, C, H), dtype=jnp.float32)

    # left-padded sequences: first (L - len) positions are padding
    lengths = jnp.array([5, 3], dtype=jnp.int32)
    pos = jnp.arange(L)[None, :]
    timeline_mask = (pos < (L - lengths)[:, None])[:, :, None]   # [B, L, 1] bool
    _assert_left_padded(timeline_mask)

    fwd = jax.jit(gru_inference_layer_forward)
    experts = fwd(fused_params, seqs, timeline_mask)
    experts = [jax.block_until_ready(e) for e in experts]

    experts_ref = reference_forward(raw_params, seqs, timeline_mask)
    for e, er in zip(experts, experts_ref):
        np.testing.assert_allclose(np.asarray(e), np.asarray(er),
                                   rtol=1e-4, atol=1e-4)

    print("KERNEL_OK")
</pallas_src>

<mosaic_0001>
module attributes {stable_mosaic.version = 11 : i64} {
  func.func @kernel(%arg0: i32, %arg1: memref<16x96xf32, #tpu.memory_space<vmem>>, %arg2: memref<16x1xf32, #tpu.memory_space<vmem>>, %arg3: memref<96x384xf32, #tpu.memory_space<vmem>>, %arg4: memref<128x384xf32, #tpu.memory_space<vmem>>, %arg5: memref<1x384xf32, #tpu.memory_space<vmem>>, %arg6: memref<1x128xf32, #tpu.memory_space<vmem>>, %arg7: memref<2x1024xf32, #tpu.memory_space<vmem>>) attributes {dimension_semantics = [#tpu.dimension_semantics<arbitrary>], iteration_bounds = array<i64: 1>, scalar_prefetch = 0 : i64, scratch_operands = 0 : i64, tpu.core_type = #tpu.core_type<tc>, window_params = [{pipeline_mode = #tpu.pipeline_mode<synchronous>, transform_indices = @transform_0, window_bounds = array<i64: 16, 96>}, {pipeline_mode = #tpu.pipeline_mode<synchronous>, transform_indices = @transform_1, window_bounds = array<i64: 16, 1>}, {pipeline_mode = #tpu.pipeline_mode<synchronous>, transform_indices = @transform_2, window_bounds = array<i64: 96, 384>}, {pipeline_mode = #tpu.pipeline_mode<synchronous>, transform_indices = @transform_3, window_bounds = array<i64: 128, 384>}, {pipeline_mode = #tpu.pipeline_mode<synchronous>, transform_indices = @transform_4, window_bounds = array<i64: 1, 384>}, {pipeline_mode = #tpu.pipeline_mode<synchronous>, transform_indices = @transform_5, window_bounds = array<i64: 1, 128>}, {pipeline_mode = #tpu.pipeline_mode<synchronous>, transform_indices = @transform_6, window_bounds = array<i64: 2, 1024>}]} {
    %c0 = arith.constant 0 : index
    %c0_0 = arith.constant 0 : index
    %0 = vector.load %arg1[%c0, %c0_0] : memref<16x96xf32, #tpu.memory_space<vmem>>, vector<16x96xf32>
    %c0_1 = arith.constant 0 : index
    %c0_2 = arith.constant 0 : index
    %1 = vector.load %arg3[%c0_1, %c0_2] : memref<96x384xf32, #tpu.memory_space<vmem>>, vector<96x384xf32>
    %cst = arith.constant dense<0.000000e+00> : vector<16x384xf32>
    %2 = tpu.matmul %0, %1, %cst {dimension_numbers = #tpu.dot_dimension_numbers<[1], [0], [0], [1], [0, 0, 1, 1], [], []>} : vector<16x96xf32>, vector<96x384xf32>, vector<16x384xf32> -> vector<16x384xf32>
    %c0_3 = arith.constant 0 : index
    %c0_4 = arith.constant 0 : index
    %3 = vector.load %arg5[%c0_3, %c0_4] : memref<1x384xf32, #tpu.memory_space<vmem>>, vector<1x384xf32>
    %4 = vector.broadcast %3 : vector<1x384xf32> to vector<16x384xf32>
    %5 = arith.addf %2, %4 : vector<16x384xf32>
    %c0_5 = arith.constant 0 : index
    %c0_6 = arith.constant 0 : index
    %6 = vector.load %arg4[%c0_5, %c0_6] : memref<128x384xf32, #tpu.memory_space<vmem>>, vector<128x384xf32>
    %c0_7 = arith.constant 0 : index
    %c0_8 = arith.constant 0 : index
    %7 = vector.load %arg6[%c0_7, %c0_8] : memref<1x128xf32, #tpu.memory_space<vmem>>, vector<1x128xf32>
    %c0_9 = arith.constant 0 : index
    %c0_10 = arith.constant 0 : index
    %8 = vector.load %arg2[%c0_9, %c0_10] : memref<16x1xf32, #tpu.memory_space<vmem>>, vector<16x1xf32>
    %cst_11 = arith.constant 0.000000e+00 : f32
    %9 = vector.broadcast %cst_11 : f32 to vector<2x128xf32>
    %10 = vector.extract_strided_slice %5 {offsets = [0, 0], sizes = [2, 384], strides = [1, 1]} : vector<16x384xf32> to vector<2x384xf32>
    %11 = vector.extract_strided_slice %8 {offsets = [0, 0], sizes = [2, 1], strides = [1, 1]} : vector<16x1xf32> to vector<2x1xf32>
    %cst_12 = arith.constant dense<0.000000e+00> : vector<2x384xf32>
    %12 = tpu.matmul %9, %6, %cst_12 {dimension_numbers = #tpu.dot_dimension_numbers<[1], [0], [0], [1], [0, 0, 1, 1], [], []>} : vector<2x128xf32>, vector<128x384xf32>, vector<2x384xf32> -> vector<2x384xf32>
    %13 = vector.extract_strided_slice %10 {offsets = [0, 0], sizes = [2, 128], strides = [1, 1]} : vector<2x384xf32> to vector<2x128xf32>
    %14 = vector.extract_strided_slice %12 {offsets = [0, 0], sizes = [2, 128], strides = [1, 1]} : vector<2x384xf32> to vector<2x128xf32>
    %15 = arith.addf %13, %14 : vector<2x128xf32>
    %16 = arith.negf %15 : vector<2x128xf32>
    %17 = math.exp %16 : vector<2x128xf32>
    %cst_13 = arith.constant 1.000000e+00 : f32
    %18 = vector.broadcast %cst_13 : f32 to vector<2x128xf32>
    %19 = arith.addf %18, %17 : vector<2x128xf32>
    %20 = arith.divf %18, %19 : vector<2x128xf32>
    %21 = vector.extract_strided_slice %10 {offsets = [0, 128], sizes = [2, 128], strides = [1, 1]} : vector<2x384xf32> to vector<2x128xf32>
    %22 = vector.extract_strided_slice %12 {offsets = [0, 128], sizes = [2, 128], strides = [1, 1]} : vector<2x384xf32> to vector<2x128xf32>
    %23 = arith.addf %21, %22 : vector<2x128xf32>
    %24 = arith.negf %23 : vector<2x128xf32>
    %25 = math.exp %24 : vector<2x128xf32>
    %cst_14 = arith.constant 1.000000e+00 : f32
    %26 = vector.broadcast %cst_14 : f32 to vector<2x128xf32>
    %27 = arith.addf %26, %25 : vector<2x128xf32>
    %28 = arith.divf %26, %27 : vector<2x128xf32>
    %29 = vector.extract_strided_slice %10 {offsets = [0, 256], sizes = [2, 128], strides = [1, 1]} : vector<2x384xf32> to vector<2x128xf32>
    %30 = vector.extract_strided_slice %12 {offsets = [0, 256], sizes = [2, 128], strides = [1, 1]} : vector<2x384xf32> to vector<2x128xf32>
    %31 = vector.broadcast %7 : vector<1x128xf32> to vector<2x128xf32>
    %32 = arith.addf %30, %31 : vector<2x128xf32>
    %33 = arith.mulf %20, %32 : vector<2x128xf32>
    %34 = arith.addf %29, %33 : vector<2x128xf32>
    %35 = math.tanh %34 : vector<2x128xf32>
    %cst_15 = arith.constant 1.000000e+00 : f32
    %36 = vector.broadcast %cst_15 : f32 to vector<2x128xf32>
    %37 = arith.subf %36, %28 : vector<2x128xf32>
    %38 = arith.mulf %37, %35 : vector<2x128xf32>
    %39 = arith.mulf %28, %9 : vector<2x128xf32>
    %40 = arith.addf %38, %39 : vector<2x128xf32>
    %41 = arith.subf %40, %9 : vector<2x128xf32>
    %42 = vector.broadcast %11 : vector<2x1xf32> to vector<2x128xf32>
    %43 = arith.mulf %42, %41 : vector<2x128xf32>
    %44 = arith.addf %9, %43 : vector<2x128xf32>
    %c0_16 = arith.constant 0 : index
    %c0_17 = arith.constant 0 : index
    %45 = vector.load %arg7[%c0_16, %c0_17] : memref<2x1024xf32, #tpu.memory_space<vmem>>, vector<2x128xf32>
    tpu.vector_store %arg7[%c0_16, %c0_17], %44 {strides = array<i32>} : memref<2x1024xf32, #tpu.memory_space<vmem>>, vector<2x128xf32>,
    %46 = vector.extract_strided_slice %5 {offsets = [2, 0], sizes = [2, 384], strides = [1, 1]} : vector<16x384xf32> to vector<2x384xf32>
    %47 = vector.extract_strided_slice %8 {offsets = [2, 0], sizes = [2, 1], strides = [1, 1]} : vector<16x1xf32> to vector<2x1xf32>
    %cst_18 = arith.constant dense<0.000000e+00> : vector<2x384xf32>
    %48 = tpu.matmul %44, %6, %cst_18 {dimension_numbers = #tpu.dot_dimension_numbers<[1], [0], [0], [1], [0, 0, 1, 1], [], []>} : vector<2x128xf32>, vector<128x384xf32>, vector<2x384xf32> -> vector<2x384xf32>
    %49 = vector.extract_strided_slice %46 {offsets = [0, 0], sizes = [2, 128], strides = [1, 1]} : vector<2x384xf32> to vector<2x128xf32>
    %50 = vector.extract_strided_slice %48 {offsets = [0, 0], sizes = [2, 128], strides = [1, 1]} : vector<2x384xf32> to vector<2x128xf32>
    %51 = arith.addf %49, %50 : vector<2x128xf32>
    %52 = arith.negf %51 : vector<2x128xf32>
    %53 = math.exp %52 : vector<2x128xf32>
    %cst_19 = arith.constant 1.000000e+00 : f32
    %54 = vector.broadcast %cst_19 : f32 to vector<2x128xf32>
    %55 = arith.addf %54, %53 : vector<2x128xf32>
    %56 = arith.divf %54, %55 : vector<2x128xf32>
    %57 = vector.extract_strided_slice %46 {offsets = [0, 128], sizes = [2, 128], strides = [1, 1]} : vector<2x384xf32> to vector<2x128xf32>
    %58 = vector.extract_strided_slice %48 {offsets = [0, 128], sizes = [2, 128], strides = [1, 1]} : vector<2x384xf32> to vector<2x128xf32>
    %59 = arith.addf %57, %58 : vector<2x128xf32>
    %60 = arith.negf %59 : vector<2x128xf32>
    %61 = math.exp %60 : vector<2x128xf32>
    %cst_20 = arith.constant 1.000000e+00 : f32
    %62 = vector.broadcast %cst_20 : f32 to vector<2x128xf32>
    %63 = arith.addf %62, %61 : vector<2x128xf32>
    %64 = arith.divf %62, %63 : vector<2x128xf32>
    %65 = vector.extract_strided_slice %46 {offsets = [0, 256], sizes = [2, 128], strides = [1, 1]} : vector<2x384xf32> to vector<2x128xf32>
    %66 = vector.extract_strided_slice %48 {offsets = [0, 256], sizes = [2, 128], strides = [1, 1]} : vector<2x384xf32> to vector<2x128xf32>
    %67 = vector.broadcast %7 : vector<1x128xf32> to vector<2x128xf32>
    %68 = arith.addf %66, %67 : vector<2x128xf32>
    %69 = arith.mulf %56, %68 : vector<2x128xf32>
    %70 = arith.addf %65, %69 : vector<2x128xf32>
    %71 = math.tanh %70 : vector<2x128xf32>
    %cst_21 = arith.constant 1.000000e+00 : f32
    %72 = vector.broadcast %cst_21 : f32 to vector<2x128xf32>
    %73 = arith.subf %72, %64 : vector<2x128xf32>
    %74 = arith.mulf %73, %71 : vector<2x128xf32>
    %75 = arith.mulf %64, %44 : vector<2x128xf32>
    %76 = arith.addf %74, %75 : vector<2x128xf32>
    %77 = arith.subf %76, %44 : vector<2x128xf32>
    %78 = vector.broadcast %47 : vector<2x1xf32> to vector<2x128xf32>
    %79 = arith.mulf %78, %77 : vector<2x128xf32>
    %80 = arith.addf %44, %79 : vector<2x128xf32>
    %c0_22 = arith.constant 0 : index
    %c128 = arith.constant 128 : index
    %81 = vector.load %arg7[%c0_22, %c128] : memref<2x1024xf32, #tpu.memory_space<vmem>>, vector<2x128xf32>
    tpu.vector_store %arg7[%c0_22, %c128], %80 {strides = array<i32>} : memref<2x1024xf32, #tpu.memory_space<vmem>>, vector<2x128xf32>,
    %82 = vector.extract_strided_slice %5 {offsets = [4, 0], sizes = [2, 384], strides = [1, 1]} : vector<16x384xf32> to vector<2x384xf32>
    %83 = vector.extract_strided_slice %8 {offsets = [4, 0], sizes = [2, 1], strides = [1, 1]} : vector<16x1xf32> to vector<2x1xf32>
    %cst_23 = arith.constant dense<0.000000e+00> : vector<2x384xf32>
    %84 = tpu.matmul %80, %6, %cst_23 {dimension_numbers = #tpu.dot_dimension_numbers<[1], [0], [0], [1], [0, 0, 1, 1], [], []>} : vector<2x128xf32>, vector<128x384xf32>, vector<2x384xf32> -> vector<2x384xf32>
    %85 = vector.extract_strided_slice %82 {offsets = [0, 0], sizes = [2, 128], strides = [1, 1]} : vector<2x384xf32> to vector<2x128xf32>
    %86 = vector.extract_strided_slice %84 {offsets = [0, 0], sizes = [2, 128], strides = [1, 1]} : vector<2x384xf32> to vector<2x128xf32>
    %87 = arith.addf %85, %86 : vector<2x128xf32>
    %88 = arith.negf %87 : vector<2x128xf32>
    %89 = math.exp %88 : vector<2x128xf32>
    %cst_24 = arith.constant 1.000000e+00 : f32
    %90 = vector.broadcast %cst_24 : f32 to vector<2x128xf32>
    %91 = arith.addf %90, %89 : vector<2x128xf32>
    %92 = arith.divf %90, %91 : vector<2x128xf32>
    %93 = vector.extract_strided_slice %82 {offsets = [0, 128], sizes = [2, 128], strides = [1, 1]} : vector<2x384xf32> to vector<2x128xf32>
    %94 = vector.extract_strided_slice %84 {offsets = [0, 128], sizes = [2, 128], strides = [1, 1]} : vector<2x384xf32> to vector<2x128xf32>
    %95 = arith.addf %93, %94 : vector<2x128xf32>
    %96 = arith.negf %95 : vector<2x128xf32>
    %97 = math.exp %96 : vector<2x128xf32>
    %cst_25 = arith.constant 1.000000e+00 : f32
    %98 = vector.broadcast %cst_25 : f32 to vector<2x128xf32>
    %99 = arith.addf %98, %97 : vector<2x128xf32>
    %100 = arith.divf %98, %99 : vector<2x128xf32>
    %101 = vector.extract_strided_slice %82 {offsets = [0, 256], sizes = [2, 128], strides = [1, 1]} : vector<2x384xf32> to vector<2x128xf32>
    %102 = vector.extract_strided_slice %84 {offsets = [0, 256], sizes = [2, 128], strides = [1, 1]} : vector<2x384xf32> to vector<2x128xf32>
    %103 = vector.broadcast %7 : vector<1x128xf32> to vector<2x128xf32>
    %104 = arith.addf %102, %103 : vector<2x128xf32>
    %105 = arith.mulf %92, %104 : vector<2x128xf32>
    %106 = arith.addf %101, %105 : vector<2x128xf32>
    %107 = math.tanh %106 : vector<2x128xf32>
    %cst_26 = arith.constant 1.000000e+00 : f32
    %108 = vector.broadcast %cst_26 : f32 to vector<2x128xf32>
    %109 = arith.subf %108, %100 : vector<2x128xf32>
    %110 = arith.mulf %109, %107 : vector<2x128xf32>
    %111 = arith.mulf %100, %80 : vector<2x128xf32>
    %112 = arith.addf %110, %111 : vector<2x128xf32>
    %113 = arith.subf %112, %80 : vector<2x128xf32>
    %114 = vector.broadcast %83 : vector<2x1xf32> to vector<2x128xf32>
    %115 = arith.mulf %114, %113 : vector<2x128xf32>
    %116 = arith.addf %80, %115 : vector<2x128xf32>
    %c0_27 = arith.constant 0 : index
    %c256 = arith.constant 256 : index
    %117 = vector.load %arg7[%c0_27, %c256] : memref<2x1024xf32, #tpu.memory_space<vmem>>, vector<2x128xf32>
    tpu.vector_store %arg7[%c0_27, %c256], %116 {strides = array<i32>} : memref<2x1024xf32, #tpu.memory_space<vmem>>, vector<2x128xf32>,
    %118 = vector.extract_strided_slice %5 {offsets = [6, 0], sizes = [2, 384], strides = [1, 1]} : vector<16x384xf32> to vector<2x384xf32>
    %119 = vector.extract_strided_slice %8 {offsets = [6, 0], sizes = [2, 1], strides = [1, 1]} : vector<16x1xf32> to vector<2x1xf32>
    %cst_28 = arith.constant dense<0.000000e+00> : vector<2x384xf32>
    %120 = tpu.matmul %116, %6, %cst_28 {dimension_numbers = #tpu.dot_dimension_numbers<[1], [0], [0], [1], [0, 0, 1, 1], [], []>} : vector<2x128xf32>, vector<128x384xf32>, vector<2x384xf32> -> vector<2x384xf32>
    %121 = vector.extract_strided_slice %118 {offsets = [0, 0], sizes = [2, 128], strides = [1, 1]} : vector<2x384xf32> to vector<2x128xf32>
    %122 = vector.extract_strided_slice %120 {offsets = [0, 0], sizes = [2, 128], strides = [1, 1]} : vector<2x384xf32> to vector<2x128xf32>
    %123 = arith.addf %121, %122 : vector<2x128xf32>
    %124 = arith.negf %123 : vector<2x128xf32>
    %125 = math.exp %124 : vector<2x128xf32>
    %cst_29 = arith.constant 1.000000e+00 : f32
    %126 = vector.broadcast %cst_29 : f32 to vector<2x128xf32>
    %127 = arith.addf %126, %125 : vector<2x128xf32>
    %128 = arith.divf %126, %127 : vector<2x128xf32>
    %129 = vector.extract_strided_slice %118 {offsets = [0, 128], sizes = [2, 128], strides = [1, 1]} : vector<2x384xf32> to vector<2x128xf32>
    %130 = vector.extract_strided_slice %120 {offsets = [0, 128], sizes = [2, 128], strides = [1, 1]} : vector<2x384xf32> to vector<2x128xf32>
    %131 = arith.addf %129, %130 : vector<2x128xf32>
    %132 = arith.negf %131 : vector<2x128xf32>
    %133 = math.exp %132 : vector<2x128xf32>
    %cst_30 = arith.constant 1.000000e+00 : f32
    %134 = vector.broadcast %cst_30 : f32 to vector<2x128xf32>
    %135 = arith.addf %134, %133 : vector<2x128xf32>
    %136 = arith.divf %134, %135 : vector<2x128xf32>
    %137 = vector.extract_strided_slice %118 {offsets = [0, 256], sizes = [2, 128], strides = [1, 1]} : vector<2x384xf32> to vector<2x128xf32>
    %138 = vector.extract_strided_slice %120 {offsets = [0, 256], sizes = [2, 128], strides = [1, 1]} : vector<2x384xf32> to vector<2x128xf32>
    %139 = vector.broadcast %7 : vector<1x128xf32> to vector<2x128xf32>
    %140 = arith.addf %138, %139 : vector<2x128xf32>
    %141 = arith.mulf %128, %140 : vector<2x128xf32>
    %142 = arith.addf %137, %141 : vector<2x128xf32>
    %143 = math.tanh %142 : vector<2x128xf32>
    %cst_31 = arith.constant 1.000000e+00 : f32
    %144 = vector.broadcast %cst_31 : f32 to vector<2x128xf32>
    %145 = arith.subf %144, %136 : vector<2x128xf32>
    %146 = arith.mulf %145, %143 : vector<2x128xf32>
    %147 = arith.mulf %136, %116 : vector<2x128xf32>
    %148 = arith.addf %146, %147 : vector<2x128xf32>
    %149 = arith.subf %148, %116 : vector<2x128xf32>
    %150 = vector.broadcast %119 : vector<2x1xf32> to vector<2x128xf32>
    %151 = arith.mulf %150, %149 : vector<2x128xf32>
    %152 = arith.addf %116, %151 : vector<2x128xf32>
    %c0_32 = arith.constant 0 : index
    %c384 = arith.constant 384 : index
    %153 = vector.load %arg7[%c0_32, %c384] : memref<2x1024xf32, #tpu.memory_space<vmem>>, vector<2x128xf32>
    tpu.vector_store %arg7[%c0_32, %c384], %152 {strides = array<i32>} : memref<2x1024xf32, #tpu.memory_space<vmem>>, vector<2x128xf32>,
    %154 = vector.extract_strided_slice %5 {offsets = [8, 0], sizes = [2, 384], strides = [1, 1]} : vector<16x384xf32> to vector<2x384xf32>
    %155 = vector.extract_strided_slice %8 {offsets = [8, 0], sizes = [2, 1], strides = [1, 1]} : vector<16x1xf32> to vector<2x1xf32>
    %cst_33 = arith.constant dense<0.000000e+00> : vector<2x384xf32>
    %156 = tpu.matmul %152, %6, %cst_33 {dimension_numbers = #tpu.dot_dimension_numbers<[1], [0], [0], [1], [0, 0, 1, 1], [], []>} : vector<2x128xf32>, vector<128x384xf32>, vector<2x384xf32> -> vector<2x384xf32>
    %157 = vector.extract_strided_slice %154 {offsets = [0, 0], sizes = [2, 128], strides = [1, 1]} : vector<2x384xf32> to vector<2x128xf32>
    %158 = vector.extract_strided_slice %156 {offsets = [0, 0], sizes = [2, 128], strides = [1, 1]} : vector<2x384xf32> to vector<2x128xf32>
    %159 = arith.addf %157, %158 : vector<2x128xf32>
    %160 = arith.negf %159 : vector<2x128xf32>
    %161 = math.exp %160 : vector<2x128xf32>
    %cst_34 = arith.constant 1.000000e+00 : f32
    %162 = vector.broadcast %cst_34 : f32 to vector<2x128xf32>
    %163 = arith.addf %162, %161 : vector<2x128xf32>
    %164 = arith.divf %162, %163 : vector<2x128xf32>
    %165 = vector.extract_strided_slice %154 {offsets = [0, 128], sizes = [2, 128], strides = [1, 1]} : vector<2x384xf32> to vector<2x128xf32>
    %166 = vector.extract_strided_slice %156 {offsets = [0, 128], sizes = [2, 128], strides = [1, 1]} : vector<2x384xf32> to vector<2x128xf32>
    %167 = arith.addf %165, %166 : vector<2x128xf32>
    %168 = arith.negf %167 : vector<2x128xf32>
    %169 = math.exp %168 : vector<2x128xf32>
    %cst_35 = arith.constant 1.000000e+00 : f32
    %170 = vector.broadcast %cst_35 : f32 to vector<2x128xf32>
    %171 = arith.addf %170, %169 : vector<2x128xf32>
    %172 = arith.divf %170, %171 : vector<2x128xf32>
    %173 = vector.extract_strided_slice %154 {offsets = [0, 256], sizes = [2, 128], strides = [1, 1]} : vector<2x384xf32> to vector<2x128xf32>
    %174 = vector.extract_strided_slice %156 {offsets = [0, 256], sizes = [2, 128], strides = [1, 1]} : vector<2x384xf32> to vector<2x128xf32>
    %175 = vector.broadcast %7 : vector<1x128xf32> to vector<2x128xf32>
    %176 = arith.addf %174, %175 : vector<2x128xf32>
    %177 = arith.mulf %164, %176 : vector<2x128xf32>
    %178 = arith.addf %173, %177 : vector<2x128xf32>
    %179 = math.tanh %178 : vector<2x128xf32>
    %cst_36 = arith.constant 1.000000e+00 : f32
    %180 = vector.broadcast %cst_36 : f32 to vector<2x128xf32>
    %181 = arith.subf %180, %172 : vector<2x128xf32>
    %182 = arith.mulf %181, %179 : vector<2x128xf32>
    %183 = arith.mulf %172, %152 : vector<2x128xf32>
    %184 = arith.addf %182, %183 : vector<2x128xf32>
    %185 = arith.subf %184, %152 : vector<2x128xf32>
    %186 = vector.broadcast %155 : vector<2x1xf32> to vector<2x128xf32>
    %187 = arith.mulf %186, %185 : vector<2x128xf32>
    %188 = arith.addf %152, %187 : vector<2x128xf32>
    %c0_37 = arith.constant 0 : index
    %c512 = arith.constant 512 : index
    %189 = vector.load %arg7[%c0_37, %c512] : memref<2x1024xf32, #tpu.memory_space<vmem>>, vector<2x128xf32>
    tpu.vector_store %arg7[%c0_37, %c512], %188 {strides = array<i32>} : memref<2x1024xf32, #tpu.memory_space<vmem>>, vector<2x128xf32>,
    %190 = vector.extract_strided_slice %5 {offsets = [10, 0], sizes = [2, 384], strides = [1, 1]} : vector<16x384xf32> to vector<2x384xf32>
    %191 = vector.extract_strided_slice %8 {offsets = [10, 0], sizes = [2, 1], strides = [1, 1]} : vector<16x1xf32> to vector<2x1xf32>
    %cst_38 = arith.constant dense<0.000000e+00> : vector<2x384xf32>
    %192 = tpu.matmul %188, %6, %cst_38 {dimension_numbers = #tpu.dot_dimension_numbers<[1], [0], [0], [1], [0, 0, 1, 1], [], []>} : vector<2x128xf32>, vector<128x384xf32>, vector<2x384xf32> -> vector<2x384xf32>
    %193 = vector.extract_strided_slice %190 {offsets = [0, 0], sizes = [2, 128], strides = [1, 1]} : vector<2x384xf32> to vector<2x128xf32>
    %194 = vector.extract_strided_slice %192 {offsets = [0, 0], sizes = [2, 128], strides = [1, 1]} : vector<2x384xf32> to vector<2x128xf32>
    %195 = arith.addf %193, %194 : vector<2x128xf32>
    %196 = arith.negf %195 : vector<2x128xf32>
    %197 = math.exp %196 : vector<2x128xf32>
    %cst_39 = arith.constant 1.000000e+00 : f32
    %198 = vector.broadcast %cst_39 : f32 to vector<2x128xf32>
    %199 = arith.addf %198, %197 : vector<2x128xf32>
    %200 = arith.divf %198, %199 : vector<2x128xf32>
    %201 = vector.extract_strided_slice %190 {offsets = [0, 128], sizes = [2, 128], strides = [1, 1]} : vector<2x384xf32> to vector<2x128xf32>
    %202 = vector.extract_strided_slice %192 {offsets = [0, 128], sizes = [2, 128], strides = [1, 1]} : vector<2x384xf32> to vector<2x128xf32>
    %203 = arith.addf %201, %202 : vector<2x128xf32>
    %204 = arith.negf %203 : vector<2x128xf32>
    %205 = math.exp %204 : vector<2x128xf32>
    %cst_40 = arith.constant 1.000000e+00 : f32
    %206 = vector.broadcast %cst_40 : f32 to vector<2x128xf32>
    %207 = arith.addf %206, %205 : vector<2x128xf32>
    %208 = arith.divf %206, %207 : vector<2x128xf32>
    %209 = vector.extract_strided_slice %190 {offsets = [0, 256], sizes = [2, 128], strides = [1, 1]} : vector<2x384xf32> to vector<2x128xf32>
    %210 = vector.extract_strided_slice %192 {offsets = [0, 256], sizes = [2, 128], strides = [1, 1]} : vector<2x384xf32> to vector<2x128xf32>
    %211 = vector.broadcast %7 : vector<1x128xf32> to vector<2x128xf32>
    %212 = arith.addf %210, %211 : vector<2x128xf32>
    %213 = arith.mulf %200, %212 : vector<2x128xf32>
    %214 = arith.addf %209, %213 : vector<2x128xf32>
    %215 = math.tanh %214 : vector<2x128xf32>
    %cst_41 = arith.constant 1.000000e+00 : f32
    %216 = vector.broadcast %cst_41 : f32 to vector<2x128xf32>
    %217 = arith.subf %216, %208 : vector<2x128xf32>
    %218 = arith.mulf %217, %215 : vector<2x128xf32>
    %219 = arith.mulf %208, %188 : vector<2x128xf32>
    %220 = arith.addf %218, %219 : vector<2x128xf32>
    %221 = arith.subf %220, %188 : vector<2x128xf32>
    %222 = vector.broadcast %191 : vector<2x1xf32> to vector<2x128xf32>
    %223 = arith.mulf %222, %221 : vector<2x128xf32>
    %224 = arith.addf %188, %223 : vector<2x128xf32>
    %c0_42 = arith.constant 0 : index
    %c640 = arith.constant 640 : index
    %225 = vector.load %arg7[%c0_42, %c640] : memref<2x1024xf32, #tpu.memory_space<vmem>>, vector<2x128xf32>
    tpu.vector_store %arg7[%c0_42, %c640], %224 {strides = array<i32>} : memref<2x1024xf32, #tpu.memory_space<vmem>>, vector<2x128xf32>,
    %226 = vector.extract_strided_slice %5 {offsets = [12, 0], sizes = [2, 384], strides = [1, 1]} : vector<16x384xf32> to vector<2x384xf32>
    %227 = vector.extract_strided_slice %8 {offsets = [12, 0], sizes = [2, 1], strides = [1, 1]} : vector<16x1xf32> to vector<2x1xf32>
    %cst_43 = arith.constant dense<0.000000e+00> : vector<2x384xf32>
    %228 = tpu.matmul %224, %6, %cst_43 {dimension_numbers = #tpu.dot_dimension_numbers<[1], [0], [0], [1], [0, 0, 1, 1], [], []>} : vector<2x128xf32>, vector<128x384xf32>, vector<2x384xf32> -> vector<2x384xf32>
    %229 = vector.extract_strided_slice %226 {offsets = [0, 0], sizes = [2, 128], strides = [1, 1]} : vector<2x384xf32> to vector<2x128xf32>
    %230 = vector.extract_strided_slice %228 {offsets = [0, 0], sizes = [2, 128], strides = [1, 1]} : vector<2x384xf32> to vector<2x128xf32>
    %231 = arith.addf %229, %230 : vector<2x128xf32>
    %232 = arith.negf %231 : vector<2x128xf32>
    %233 = math.exp %232 : vector<2x128xf32>
    %cst_44 = arith.constant 1.000000e+00 : f32
    %234 = vector.broadcast %cst_44 : f32 to vector<2x128xf32>
    %235 = arith.addf %234, %233 : vector<2x128xf32>
    %236 = arith.divf %234, %235 : vector<2x128xf32>
    %237 = vector.extract_strided_slice %226 {offsets = [0, 128], sizes = [2, 128], strides = [1, 1]} : vector<2x384xf32> to vector<2x128xf32>
    %238 = vector.extract_strided_slice %228 {offsets = [0, 128], sizes = [2, 128], strides = [1, 1]} : vector<2x384xf32> to vector<2x128xf32>
    %239 = arith.addf %237, %238 : vector<2x128xf32>
    %240 = arith.negf %239 : vector<2x128xf32>
    %241 = math.exp %240 : vector<2x128xf32>
    %cst_45 = arith.constant 1.000000e+00 : f32
    %242 = vector.broadcast %cst_45 : f32 to vector<2x128xf32>
    %243 = arith.addf %242, %241 : vector<2x128xf32>
    %244 = arith.divf %242, %243 : vector<2x128xf32>
    %245 = vector.extract_strided_slice %226 {offsets = [0, 256], sizes = [2, 128], strides = [1, 1]} : vector<2x384xf32> to vector<2x128xf32>
    %246 = vector.extract_strided_slice %228 {offsets = [0, 256], sizes = [2, 128], strides = [1, 1]} : vector<2x384xf32> to vector<2x128xf32>
    %247 = vector.broadcast %7 : vector<1x128xf32> to vector<2x128xf32>
    %248 = arith.addf %246, %247 : vector<2x128xf32>
    %249 = arith.mulf %236, %248 : vector<2x128xf32>
    %250 = arith.addf %245, %249 : vector<2x128xf32>
    %251 = math.tanh %250 : vector<2x128xf32>
    %cst_46 = arith.constant 1.000000e+00 : f32
    %252 = vector.broadcast %cst_46 : f32 to vector<2x128xf32>
    %253 = arith.subf %252, %244 : vector<2x128xf32>
    %254 = arith.mulf %253, %251 : vector<2x128xf32>
    %255 = arith.mulf %244, %224 : vector<2x128xf32>
    %256 = arith.addf %254, %255 : vector<2x128xf32>
    %257 = arith.subf %256, %224 : vector<2x128xf32>
    %258 = vector.broadcast %227 : vector<2x1xf32> to vector<2x128xf32>
    %259 = arith.mulf %258, %257 : vector<2x128xf32>
    %260 = arith.addf %224, %259 : vector<2x128xf32>
    %c0_47 = arith.constant 0 : index
    %c768 = arith.constant 768 : index
    %261 = vector.load %arg7[%c0_47, %c768] : memref<2x1024xf32, #tpu.memory_space<vmem>>, vector<2x128xf32>
    tpu.vector_store %arg7[%c0_47, %c768], %260 {strides = array<i32>} : memref<2x1024xf32, #tpu.memory_space<vmem>>, vector<2x128xf32>,
    %262 = vector.extract_strided_slice %5 {offsets = [14, 0], sizes = [2, 384], strides = [1, 1]} : vector<16x384xf32> to vector<2x384xf32>
    %263 = vector.extract_strided_slice %8 {offsets = [14, 0], sizes = [2, 1], strides = [1, 1]} : vector<16x1xf32> to vector<2x1xf32>
    %cst_48 = arith.constant dense<0.000000e+00> : vector<2x384xf32>
    %264 = tpu.matmul %260, %6, %cst_48 {dimension_numbers = #tpu.dot_dimension_numbers<[1], [0], [0], [1], [0, 0, 1, 1], [], []>} : vector<2x128xf32>, vector<128x384xf32>, vector<2x384xf32> -> vector<2x384xf32>
    %265 = vector.extract_strided_slice %262 {offsets = [0, 0], sizes = [2, 128], strides = [1, 1]} : vector<2x384xf32> to vector<2x128xf32>
    %266 = vector.extract_strided_slice %264 {offsets = [0, 0], sizes = [2, 128], strides = [1, 1]} : vector<2x384xf32> to vector<2x128xf32>
    %267 = arith.addf %265, %266 : vector<2x128xf32>
    %268 = arith.negf %267 : vector<2x128xf32>
    %269 = math.exp %268 : vector<2x128xf32>
    %cst_49 = arith.constant 1.000000e+00 : f32
    %270 = vector.broadcast %cst_49 : f32 to vector<2x128xf32>
    %271 = arith.addf %270, %269 : vector<2x128xf32>
    %272 = arith.divf %270, %271 : vector<2x128xf32>
    %273 = vector.extract_strided_slice %262 {offsets = [0, 128], sizes = [2, 128], strides = [1, 1]} : vector<2x384xf32> to vector<2x128xf32>
    %274 = vector.extract_strided_slice %264 {offsets = [0, 128], sizes = [2, 128], strides = [1, 1]} : vector<2x384xf32> to vector<2x128xf32>
    %275 = arith.addf %273, %274 : vector<2x128xf32>
    %276 = arith.negf %275 : vector<2x128xf32>
    %277 = math.exp %276 : vector<2x128xf32>
    %cst_50 = arith.constant 1.000000e+00 : f32
    %278 = vector.broadcast %cst_50 : f32 to vector<2x128xf32>
    %279 = arith.addf %278, %277 : vector<2x128xf32>
    %280 = arith.divf %278, %279 : vector<2x128xf32>
    %281 = vector.extract_strided_slice %262 {offsets = [0, 256], sizes = [2, 128], strides = [1, 1]} : vector<2x384xf32> to vector<2x128xf32>
    %282 = vector.extract_strided_slice %264 {offsets = [0, 256], sizes = [2, 128], strides = [1, 1]} : vector<2x384xf32> to vector<2x128xf32>
    %283 = vector.broadcast %7 : vector<1x128xf32> to vector<2x128xf32>
    %284 = arith.addf %282, %283 : vector<2x128xf32>
    %285 = arith.mulf %272, %284 : vector<2x128xf32>
    %286 = arith.addf %281, %285 : vector<2x128xf32>
    %287 = math.tanh %286 : vector<2x128xf32>
    %cst_51 = arith.constant 1.000000e+00 : f32
    %288 = vector.broadcast %cst_51 : f32 to vector<2x128xf32>
    %289 = arith.subf %288, %280 : vector<2x128xf32>
    %290 = arith.mulf %289, %287 : vector<2x128xf32>
    %291 = arith.mulf %280, %260 : vector<2x128xf32>
    %292 = arith.addf %290, %291 : vector<2x128xf32>
    %293 = arith.subf %292, %260 : vector<2x128xf32>
    %294 = vector.broadcast %263 : vector<2x1xf32> to vector<2x128xf32>
    %295 = arith.mulf %294, %293 : vector<2x128xf32>
    %296 = arith.addf %260, %295 : vector<2x128xf32>
    %c0_52 = arith.constant 0 : index
    %c896 = arith.constant 896 : index
    %297 = vector.load %arg7[%c0_52, %c896] : memref<2x1024xf32, #tpu.memory_space<vmem>>, vector<2x128xf32>
    tpu.vector_store %arg7[%c0_52, %c896], %296 {strides = array<i32>} : memref<2x1024xf32, #tpu.memory_space<vmem>>, vector<2x128xf32>,
    return
  }
  func.func @transform_0(%arg0: i32) -> (i32, i32) {
    %c0_i32 = arith.constant 0 : i32
    %c0_i32_0 = arith.constant 0 : i32
    %c0_i32_1 = arith.constant 0 : i32
    return %c0_i32, %c0_i32_0 : i32, i32
  }
  func.func @transform_1(%arg0: i32) -> (i32, i32) {
    %c0_i32 = arith.constant 0 : i32
    %c0_i32_0 = arith.constant 0 : i32
    %c0_i32_1 = arith.constant 0 : i32
    return %c0_i32, %c0_i32_0 : i32, i32
  }
  func.func @transform_2(%arg0: i32) -> (i32, i32) {
    %c0_i32 = arith.constant 0 : i32
    %c0_i32_0 = arith.constant 0 : i32
    %c0_i32_1 = arith.constant 0 : i32
    return %c0_i32, %c0_i32_0 : i32, i32
  }
  func.func @transform_3(%arg0: i32) -> (i32, i32) {
    %c0_i32 = arith.constant 0 : i32
    %c0_i32_0 = arith.constant 0 : i32
    %c0_i32_1 = arith.constant 0 : i32
    return %c0_i32, %c0_i32_0 : i32, i32
  }
  func.func @transform_4(%arg0: i32) -> (i32, i32) {
    %c0_i32 = arith.constant 0 : i32
    %c0_i32_0 = arith.constant 0 : i32
    %c0_i32_1 = arith.constant 0 : i32
    return %c0_i32, %c0_i32_0 : i32, i32
  }
  func.func @transform_5(%arg0: i32) -> (i32, i32) {
    %c0_i32 = arith.constant 0 : i32
    %c0_i32_0 = arith.constant 0 : i32
    %c0_i32_1 = arith.constant 0 : i32
    return %c0_i32, %c0_i32_0 : i32, i32
  }
  func.func @transform_6(%arg0: i32) -> (i32, i32) {
    %c0_i32 = arith.constant 0 : i32
    %c0_i32_0 = arith.constant 0 : i32
    %c0_i32_1 = arith.constant 0 : i32
    return %c0_i32, %c0_i32_0 : i32, i32
  }
}

</mosaic_0001>

<bundles_post_ra>
// kernel: gru_inference_layer_forward.1
= control target key start
LH: loop header
LB: loop body
LE: loop exit
PB: predicated region body
PF: predicated region fallthrough
CT: control target
= control target key end

     0   :  { %11 = vsyncpa [#allocation3], 0  ;;  %s2235_s0 = inlined_call_operand.vmem [shape: f32[16,96], index: 0, kind: input, shape index: {}]   ;;  %s2236_s1 = inlined_call_operand.vmem [shape: f32[16,1], index: 1, kind: input, shape index: {}]   ;;  %s2237_s2 = inlined_call_operand.hbm [shape: f32[96,384], index: 2, kind: input, shape index: {}]   ;;  %s2238_s3 = inlined_call_operand.hbm [shape: f32[128,384], index: 3, kind: input, shape index: {}]   ;;  %s2239_s4 = inlined_call_operand.vmem [shape: f32[1,384], index: 4, kind: input, shape index: {}]   ;;  %s2240_s5 = inlined_call_operand.vmem [shape: f32[1,128], index: 5, kind: input, shape index: {}]   ;;  %s2241_s6 = inlined_call_operand.vmem [shape: f32[2,1024], index: 6, kind: output, shape index: {}]  }
   0x1   :  { %s21_s23 = sshll.u32 %s2237_s2, 4  ;;  %s22_s23 = int_to_ptr.hbm [resolvable:$true] %s21_s23 }
   0x2   :  { %12 = vsyncpa [#allocation5], 0  ;;  %s1443_s24 = smov [#allocation2]   ;;  %s34_s28 = sshll.u32 %s2238_s3, 4  ;;  %s35_s28 = int_to_ptr.hbm [resolvable:$true] %s34_s28 }
   0x3   :  { %s23_s25 = sshll.u32 %s1443_s24, 4  ;;  %s1444_s29 = smov 384   ;;  %s24_s25 = int_to_ptr.vmem [resolvable:$true] %s23_s25 }
   0x4   :  { %s1445_s30 = smov 24   ;;  %s1446_s7 = smov [#allocation4]  }
   0x5   :  { %29 = dma.hbm_to_vmem [thread:$0]  %s22_s23, 4608, %s24_s25, [#allocation3], %s1444_s29, %s1444_s29, %s1445_s30  }
   0x6   :  { %s36_s8 = sshll.u32 %s1446_s7, 4  ;;  %s37_s8 = int_to_ptr.vmem [resolvable:$true] %s36_s8 }
   0x7   :  { %42 = dma.hbm_to_vmem [thread:$0]  %s35_s28, 6144, %s37_s8, [#allocation5], %s1444_s29, %s1444_s29, %s1445_s30  }
   0x8   :  { %1439 = dma.done.wait [#allocation3], 4608  }
   0x9   :  { %1440 = vsyncadd [#allocation3], 4294962688 }
   0xa   :  { %1441 = dma.done.wait [#allocation5], 6144  }
   0xb   :  { %1442 = vsyncadd [#allocation5], 4294961152  ;;  %v90_v0 = vld [vmem:[#allocation2 + $0x108] sm:$0xff]  ;;  %v87_v2 = vld [vmem:[#allocation2 + $0xf0] sm:$0xff]  ;;  %vm101_vm0 = vcmask 785408   ;;  %v1447_v57 = vmov 0.0  }
   0xc   :  { %v1490_v1 = vld [vmem:[#allocation4 + $0x168] sm:$0xff]  ;;  %112 = vmatpush.msra.mxu0 %v90_v0  ;;  %v1493_v3 = vld [vmem:[#allocation4 + $0x150] sm:$0xff]  ;;  %v84_v4 = vld [vmem:[#allocation2 + $0xd8] sm:$0xff]  ;;  %v1448_v63 = vmov 0  }
   0xd   :  { %228 = vmatpush.msra.mxu3 %v1490_v1  ;;  %v1495_v5 = vld [vmem:[#allocation4 + $0x138] sm:$0xff]  ;;  %v81_v6 = vld [vmem:[#allocation2 + $0xc0] sm:$0xff]  ;;  %v91_v8 = vld [vmem:[#allocation2 + $0x110] sm:$0xff]  ;;  %1260 = vset.pattern.permute.xlu0 %v1448_v63 }
   0xe   :  { %113 = vmatpush.msra.mxu0 %v87_v2  ;;  %v1498_v7 = vld [vmem:[#allocation4 + $0x120] sm:$0xff]  ;;  %v88_v9 = vld [vmem:[#allocation2 + $0xf8] sm:$0xff]  ;;  %v78_v10 = vld [vmem:[#allocation2 + $0xa8] sm:$0xff]  ;;  %135 = vmatpush.msra.mxu1 %v91_v8 }
   0xf   :  { %229 = vmatpush.msra.mxu3 %v1493_v3  ;;  %v1501_v11 = vld [vmem:[#allocation4 + $0x108] sm:$0xff]  ;;  %v85_v12 = vld [vmem:[#allocation2 + $0xe0] sm:$0xff]  ;;  %v75_v13 = vld [vmem:[#allocation2 + $0x90] sm:$0xff] }
  0x10   :  { %114 = vmatpush.msra.mxu0 %v84_v4  ;;  %v1504_v14 = vld [vmem:[#allocation4 + $0xf0] sm:$0xff]  ;;  %136 = vmatpush.msra.mxu1 %v88_v9  ;;  %v82_v15 = vld [vmem:[#allocation2 + $0xc8] sm:$0xff]  ;;  %v72_v16 = vld [vmem:[#allocation2 + $0x78] sm:$0xff] }
  0x11   :  { %230 = vmatpush.msra.mxu3 %v1495_v5  ;;  %v1507_v17 = vld [vmem:[#allocation4 + $0xd8] sm:$0xff]  ;;  %v79_v18 = vld [vmem:[#allocation2 + $0xb0] sm:$0xff]  ;;  %v69_v19 = vld [vmem:[#allocation2 + $0x60] sm:$0xff] }
  0x12   :  { %115 = vmatpush.msra.mxu0 %v81_v6  ;;  %137 = vmatpush.msra.mxu1 %v85_v12  ;;  %v1510_v20 = vld [vmem:[#allocation4 + $0xc0] sm:$0xff]  ;;  %v76_v21 = vld [vmem:[#allocation2 + $0x98] sm:$0xff]  ;;  %v66_v22 = vld [vmem:[#allocation2 + $0x48] sm:$0xff] }
  0x13   :  { %231 = vmatpush.msra.mxu3 %v1498_v7  ;;  %v1513_v23 = vld [vmem:[#allocation4 + $0xa8] sm:$0xff]  ;;  %v73_v24 = vld [vmem:[#allocation2 + $0x80] sm:$0xff]  ;;  %v63_v25 = vld [vmem:[#allocation2 + $0x30] sm:$0xff] }
  0x14   :  { %116 = vmatpush.msra.mxu0 %v78_v10  ;;  %138 = vmatpush.msra.mxu1 %v82_v15  ;;  %v1516_v26 = vld [vmem:[#allocation4 + $0x90] sm:$0xff]  ;;  %v70_v27 = vld [vmem:[#allocation2 + $0x68] sm:$0xff]  ;;  %v92_v28 = vld [vmem:[#allocation2 + $0x118] sm:$0xff] }
  0x15   :  { %232 = vmatpush.msra.mxu3 %v1501_v11  ;;  %v60_v29 = vld [vmem:[#allocation2 + $0x18] sm:$0xff]  ;;  %158 = vmatpush.msra.mxu2 %v92_v28  ;;  %v89_v31 = vld [vmem:[#allocation2 + $0x100] sm:$0xff]  ;;  %v67_v32 = vld [vmem:[#allocation2 + $0x50] sm:$0xff] }
  0x16   :  { %117 = vmatpush.msra.mxu0 %v75_v13  ;;  %139 = vmatpush.msra.mxu1 %v79_v18  ;;  %v1519_v30 = vld [vmem:[#allocation4 + $0x78] sm:$0xff]  ;;  %v86_v33 = vld [vmem:[#allocation2 + $0xe8] sm:$0xff]  ;;  %v57_v34 = vld [vmem:[#allocation2] sm:$0xff] }
  0x17   :  { %233 = vmatpush.msra.mxu3 %v1504_v14  ;;  %v1522_v35 = vld [vmem:[#allocation4 + $0x60] sm:$0xff]  ;;  %159 = vmatpush.msra.mxu2 %v89_v31  ;;  %v1525_v36 = vld [vmem:[#allocation4 + $0x170] sm:$0xff]  ;;  %v64_v37 = vld [vmem:[#allocation2 + $0x38] sm:$0xff] }
  0x18   :  { %118 = vmatpush.msra.mxu0 %v72_v16  ;;  %140 = vmatpush.msra.mxu1 %v76_v21  ;;  %v1527_v38 = vld [vmem:[#allocation4 + $0x48] sm:$0xff]  ;;  %v1532_v39 = vld [vmem:[%s2235_s0] sm:$0xff]  ;;  %v1535_v40 = vld [vmem:[#allocation4 + $0x158] sm:$0xff] }
  0x19   :  { %234 = vmatpush.msra.mxu3 %v1507_v17  ;;  %160 = vmatpush.msra.mxu2 %v86_v33  ;;  %v61_v41 = vld [vmem:[#allocation2 + $0x20] sm:$0xff]  ;;  %v1538_v42 = vld [vmem:[#allocation4 + $0x30] sm:$0xff]  ;;  %v58_v45 = vld [vmem:[#allocation2 + $0x8] sm:$0xff] }
  0x1a   :  { %119 = vmatpush.msra.mxu0 %v69_v19  ;;  %141 = vmatpush.msra.mxu1 %v73_v24  ;;  %2268 = vst [vmem:[#allocation8_spill] sm:$0xff] %v1538_v42  ;;  %v83_v43 = vld [vmem:[#allocation2 + $0xd0] sm:$0xff]  ;;  %v1541_v44 = vld [vmem:[#allocation4 + $0x140] sm:$0xff]  ;;  %v1546_v46 = vld [vmem:[#allocation4 + $0x18] sm:$0xff] }
  0x1b   :  { %235 = vmatpush.msra.mxu3 %v1510_v20  ;;  %2269 = vst [vmem:[#allocation9_spill] sm:$0xff] %v1546_v46  ;;  %v1548_v47 = vld [vmem:[#allocation4 + $0x178] sm:$0xff]  ;;  %v1551_v48 = vld [vmem:[#allocation4 + $0x128] sm:$0xff]  ;;  %161 = vmatpush.msra.mxu2 %v83_v43  ;;  %v1554_v50 = vld [vmem:[#allocation4] sm:$0xff] }
  0x1c   :  { %120 = vmatpush.msra.mxu0 %v66_v22  ;;  %142 = vmatpush.msra.mxu1 %v70_v27  ;;  %v80_v49 = vld [vmem:[#allocation2 + $0xb8] sm:$0xff]  ;;  %2270 = vst [vmem:[#allocation10_spill] sm:$0xff] %v1554_v50  ;;  %v1556_v51 = vld [vmem:[#allocation4 + $0x160] sm:$0xff]  ;;  %v1559_v52 = vld [vmem:[#allocation4 + $0x110] sm:$0xff] }
  0x1d   :  { %236 = vmatpush.msra.mxu3 %v1513_v23  ;;  %v1563_v53 = vld [vmem:[#allocation4 + $0x148] sm:$0xff]  ;;  %162 = vmatpush.msra.mxu2 %v80_v49  ;;  %v1571_v55 = vld [vmem:[#allocation4 + $0xf8] sm:$0xff]  ;;  %v77_v56 = vld [vmem:[#allocation2 + $0xa0] sm:$0xff] }
  0x1e   :  { %121 = vmatpush.msra.mxu0 %v63_v25  ;;  %143 = vmatpush.msra.mxu1 %v67_v32  ;;  %v1568_v54 = vld [vmem:[%s2235_s0 + $0x8] sm:$0xff]  ;;  %v1576_v58 = vld [vmem:[#allocation4 + $0x130] sm:$0xff]  ;;  %v1578_v59 = vld [vmem:[#allocation4 + $0xe0] sm:$0xff] }
  0x1f   :  { %237 = vmatpush.msra.mxu3 %v1516_v26  ;;  %v1584_v60 = vld [vmem:[#allocation4 + $0x118] sm:$0xff]  ;;  %163 = vmatpush.msra.mxu2 %v77_v56  ;;  %v74_v61 = vld [vmem:[#allocation2 + $0x88] sm:$0xff]  ;;  %v226_v0 = vld [vmem:[%s2236_s1] sm:$0xff] }
  0x20   :  { %122 = vmatpush.msra.mxu0 %v60_v29  ;;  %144 = vmatpush.msra.mxu1 %v64_v37  ;;  %v1586_v62 = vld [vmem:[#allocation4 + $0xc8] sm:$0xff]  ;;  %v1593_v2 = vld [vmem:[#allocation4 + $0x100] sm:$0xff]  ;;  %v71_v4 = vld [vmem:[#allocation2 + $0x70] sm:$0xff] }
  0x21   :  { %238 = vmatpush.msra.mxu3 %v1519_v30  ;;  %v1597_v6 = vld [vmem:[#allocation4 + $0xb0] sm:$0xff]  ;;  %164 = vmatpush.msra.mxu2 %v74_v61  ;;  %v1601_v8 = vld [vmem:[#allocation4 + $0xe8] sm:$0xff]  ;;  %v68_v9 = vld [vmem:[#allocation2 + $0x58] sm:$0xff] }
  0x22   :  { %123 = vmatpush.msra.mxu0 %v57_v34  ;;  %145 = vmatpush.msra.mxu1 %v61_v41  ;;  %v1603_v10 = vld [vmem:[#allocation4 + $0x98] sm:$0xff]  ;;  %v1607_v12 = vld [vmem:[#allocation4 + $0xd0] sm:$0xff]  ;;  %v65_v13 = vld [vmem:[#allocation2 + $0x40] sm:$0xff] }
  0x23   :  { %239 = vmatpush.msra.mxu3 %v1522_v35  ;;  %1232 = vmatmul.msk.f32.vlgmr.msra.gmra.mxu0 %vm101_vm0, %v1532_v39  ;;  %v1610_v15 = vld [vmem:[#allocation4 + $0x80] sm:$0xff]  ;;  %v1614_v16 = vld [vmem:[#allocation4 + $0xb8] sm:$0xff]  ;;  %v62_v18 = vld [vmem:[#allocation2 + $0x28] sm:$0xff] }
  0x24   :  { %248 = vmatpush.msrb.mxu0 %v1525_v36  ;;  %146 = vmatpush.msra.mxu1 %v58_v45  ;;  %v1617_v19 = vld [vmem:[#allocation4 + $0x68] sm:$0xff]  ;;  %v1624_v22 = vld [vmem:[#allocation4 + $0xa0] sm:$0xff]  ;;  %v59_v24 = vld [vmem:[#allocation2 + $0x10] sm:$0xff] }
  0x25   :  { %240 = vmatpush.msra.mxu3 %v1527_v38  ;;  %1234 = vmatmul.msk.f32.vlgmr.msra.gmra.mxu1 %vm101_vm0, %v1532_v39  ;;  %v227_v21 = vld [vmem:[%s2236_s1 + $0x8] sm:$0xff]  ;;  %v1628_v25 = vld [vmem:[#allocation4 + $0x50] sm:$0xff]  ;;  %v1634_v28 = vld [vmem:[#allocation4 + $0x38] sm:$0xff] }
  0x26   :  { %249 = vmatpush.msrb.mxu0 %v1535_v40  ;;  %268 = vmatpush.msrb.mxu1 %v1548_v47  ;;  %v1632_v27 = vld [vmem:[#allocation4 + $0x88] sm:$0xff]  ;;  %2271 = vst [vmem:[#allocation11_spill] sm:$0xff] %v1634_v28  ;;  %v1638_v29 = vld [vmem:[#allocation4 + $0x70] sm:$0xff]  ;;  %v1642_v31 = vld [vmem:[#allocation4 + $0x20] sm:$0xff] }
  0x27   :  { %241 = vmatpush.msra.mxu3 %v1538_v42  ;;  %341 = vperm.xlu0 %1260, %v226_v0   ;;  %2272 = vst [vmem:[#allocation12_spill] sm:$0xff] %v1642_v31  ;;  %v1647_v32 = vld [vmem:[#allocation4 + $0x58] sm:$0xff]  ;;  %v1650_v33 = vld [vmem:[#allocation4 + $0x8] sm:$0xff]  ;;  %v1655_v34 = vld [vmem:[#allocation4 + $0x40] sm:$0xff] }
  0x28   :  { %250 = vmatpush.msrb.mxu0 %v1541_v44  ;;  %269 = vmatpush.msrb.mxu1 %v1556_v51  ;;  %2273 = vst [vmem:[#allocation13_spill] sm:$0xff] %v1650_v33  ;;  %v1661_v37 = vld [vmem:[#allocation4 + $0x28] sm:$0xff]  ;;  %v1796_v43 = vld [vmem:[%s2239_s4] sm:$0x7] }
  0x29   :  { %242 = vmatpush.msra.mxu3 %v1546_v46  ;;  %165 = vmatpush.msra.mxu2 %v71_v4  ;;  %2274 = vst [vmem:[#allocation14_spill] sm:$0xff] %v1655_v34  ;;  %v95_v45 = vperm.slane %v1796_v43, 0  ;;  %v96_v4 = vperm.slane %v1796_v43, 1 }
  0x2a   :  { %251 = vmatpush.msrb.mxu0 %v1551_v48  ;;  %270 = vmatpush.msrb.mxu1 %v1563_v53  ;;  %2275 = vst [vmem:[#allocation15_spill] sm:$0xff] %v1661_v37 }
  0x2b   :  { %243 = vmatpush.msra.mxu3 %v1554_v50  ;;  %1233 = vmatmul.msk.f32.gmra.mxu0 %vm101_vm0, %v1568_v54  ;;  %2277 = vst [vmem:[#allocation17_spill] sm:$0xff] %v1796_v43 }
  0x2c   :  { %244 = vmatmul.f32.vlgmr.msra.gmra.mxu3 %v1447_v57  ;;  %252 = vmatpush.msrb.mxu0 %v1559_v52 }
  0x2d   :  { %271 = vmatpush.msrb.mxu1 %v1576_v58  ;;  %367 = vmatpush.msrb.mxu3 %v1525_v36 }
  0x2e   :  { %253 = vmatpush.msrb.mxu0 %v1571_v55  ;;  %166 = vmatpush.msra.mxu2 %v68_v9 }
  0x2f   :  { %272 = vmatpush.msrb.mxu1 %v1584_v60  ;;  %368 = vmatpush.msrb.mxu3 %v1535_v40 }
  0x30   :  { %254 = vmatpush.msrb.mxu0 %v1578_v59  ;;  %167 = vmatpush.msra.mxu2 %v65_v13 }
  0x31   :  { %273 = vmatpush.msrb.mxu1 %v1593_v2  ;;  %839 = vperm.xlu0 %1260, %v227_v21  }
  0x32   :  { %255 = vmatpush.msrb.mxu0 %v1586_v62  ;;  %1235 = vmatmul.msk.f32.gmra.mxu1 %vm101_vm0, %v1568_v54 }
  0x33   :  { %274 = vmatpush.msrb.mxu1 %v1601_v8  ;;  %168 = vmatpush.msra.mxu2 %v62_v18 }
  0x34   :  { %256 = vmatpush.msrb.mxu0 %v1597_v6  ;;  %369 = vmatpush.msrb.mxu3 %v1541_v44 }
  0x35   :  { %275 = vmatpush.msrb.mxu1 %v1607_v12  ;;  %169 = vmatpush.msra.mxu2 %v59_v24 }
  0x36   :  { %257 = vmatpush.msrb.mxu0 %v1603_v10  ;;  %1236 = vmatmul.msk.f32.vlgmr.msra.gmra.mxu2 %vm101_vm0, %v1532_v39  ;;  %v1666_v39 = vld [vmem:[#allocation4 + $0x10] sm:$0xff] }
  0x37   :  { %276 = vmatpush.msrb.mxu1 %v1614_v16  ;;  %347 = vmatpush.msrb.mxu2 %v1490_v1  ;;  %2276 = vst [vmem:[#allocation16_spill] sm:$0xff] %v1666_v39 }
  0x38   :  { %258 = vmatpush.msrb.mxu0 %v1610_v15  ;;  %370 = vmatpush.msrb.mxu3 %v1551_v48 }
  0x39   :  { %277 = vmatpush.msrb.mxu1 %v1624_v22  ;;  %348 = vmatpush.msrb.mxu2 %v1493_v3 }
  0x3a   :  { %259 = vmatpush.msrb.mxu0 %v1617_v19  ;;  %371 = vmatpush.msrb.mxu3 %v1559_v52 }
  0x3b   :  { %278 = vmatpush.msrb.mxu1 %v1632_v27  ;;  %349 = vmatpush.msrb.mxu2 %v1495_v5 }
  0x3c   :  { %260 = vmatpush.msrb.mxu0 %v1628_v25  ;;  %372 = vmatpush.msrb.mxu3 %v1571_v55 }
  0x3d   :  { %279 = vmatpush.msrb.mxu1 %v1638_v29  ;;  %350 = vmatpush.msrb.mxu2 %v1498_v7 }
  0x3e   :  { %261 = vmatpush.msrb.mxu0 %v1634_v28  ;;  %373 = vmatpush.msrb.mxu3 %v1578_v59 }
  0x3f   :  { %280 = vmatpush.msrb.mxu1 %v1647_v32  ;;  %351 = vmatpush.msrb.mxu2 %v1501_v11 }
  0x40   :  { %262 = vmatpush.msrb.mxu0 %v1642_v31  ;;  %374 = vmatpush.msrb.mxu3 %v1586_v62 }
  0x41   :  { %281 = vmatpush.msrb.mxu1 %v1655_v34  ;;  %352 = vmatpush.msrb.mxu2 %v1504_v14 }
  0x42   :  { %263 = vmatpush.msrb.mxu0 %v1650_v33  ;;  %1237 = vmatmul.msk.f32.gmra.mxu2 %vm101_vm0, %v1568_v54 }
  0x43   :  { %264 = vmatmul.f32.vlgmr.msrb.gmra.mxu0 %v1447_v57  ;;  %282 = vmatpush.msrb.mxu1 %v1661_v37 }
  0x44   :  { %387 = vmatpush.msra.mxu0 %v1548_v47  ;;  %353 = vmatpush.msrb.mxu2 %v1507_v17 }
  0x45   :  { %283 = vmatpush.msrb.mxu1 %v1666_v39  ;;  %375 = vmatpush.msrb.mxu3 %v1597_v6 }
  0x46   :  { %388 = vmatpush.msra.mxu0 %v1556_v51  ;;  %284 = vmatmul.f32.vlgmr.msrb.gmra.mxu1 %v1447_v57 }
  0x47   :  { %474 = vmatpush.msra.mxu1 %v1490_v1  ;;  %354 = vmatpush.msrb.mxu2 %v1510_v20 }
  0x48   :  { %389 = vmatpush.msra.mxu0 %v1563_v53  ;;  %376 = vmatpush.msrb.mxu3 %v1603_v10 }
  0x49   :  { %475 = vmatpush.msra.mxu1 %v1493_v3  ;;  %355 = vmatpush.msrb.mxu2 %v1513_v23 }
  0x4a   :  { %390 = vmatpush.msra.mxu0 %v1576_v58  ;;  %377 = vmatpush.msrb.mxu3 %v1610_v15 }
  0x4b   :  { %476 = vmatpush.msra.mxu1 %v1495_v5  ;;  %356 = vmatpush.msrb.mxu2 %v1516_v26 }
  0x4c   :  { %391 = vmatpush.msra.mxu0 %v1584_v60  ;;  %378 = vmatpush.msrb.mxu3 %v1617_v19 }
  0x4d   :  { %477 = vmatpush.msra.mxu1 %v1498_v7  ;;  %357 = vmatpush.msrb.mxu2 %v1519_v30 }
  0x4e   :  { %392 = vmatpush.msra.mxu0 %v1593_v2  ;;  %379 = vmatpush.msrb.mxu3 %v1628_v25 }
  0x4f   :  { %478 = vmatpush.msra.mxu1 %v1501_v11  ;;  %358 = vmatpush.msrb.mxu2 %v1522_v35 }
  0x50   :  { %393 = vmatpush.msra.mxu0 %v1601_v8  ;;  %380 = vmatpush.msrb.mxu3 %v1634_v28 }
  0x51   :  { %479 = vmatpush.msra.mxu1 %v1504_v14  ;;  %359 = vmatpush.msrb.mxu2 %v1527_v38 }
  0x52   :  { %394 = vmatpush.msra.mxu0 %v1607_v12  ;;  %381 = vmatpush.msrb.mxu3 %v1642_v31 }
  0x53   :  { %480 = vmatpush.msra.mxu1 %v1507_v17  ;;  %360 = vmatpush.msrb.mxu2 %v1538_v42 }
  0x54   :  { %395 = vmatpush.msra.mxu0 %v1614_v16  ;;  %382 = vmatpush.msrb.mxu3 %v1650_v33 }
  0x55   :  { %361 = vmatpush.msrb.mxu2 %v1546_v46  ;;  %481 = vmatpush.msra.mxu1 %v1510_v20 }
  0x56   :  { %396 = vmatpush.msra.mxu0 %v1624_v22  ;;  %514 = vmatpush.msra.mxu3 %v1548_v47 }
  0x57   :  { %362 = vmatpush.msrb.mxu2 %v1554_v50  ;;  %482 = vmatpush.msra.mxu1 %v1513_v23 }
  0x58   :  { %397 = vmatpush.msra.mxu0 %v1632_v27  ;;  %515 = vmatpush.msra.mxu3 %v1556_v51 }
  0x59   :  { %494 = vmatpush.msra.mxu2 %v1525_v36  ;;  %483 = vmatpush.msra.mxu1 %v1516_v26 }
  0x5a   :  { %398 = vmatpush.msra.mxu0 %v1638_v29  ;;  %516 = vmatpush.msra.mxu3 %v1563_v53 }
  0x5b   :  { %495 = vmatpush.msra.mxu2 %v1535_v40  ;;  %484 = vmatpush.msra.mxu1 %v1519_v30 }
  0x5c   :  { %399 = vmatpush.msra.mxu0 %v1647_v32  ;;  %517 = vmatpush.msra.mxu3 %v1576_v58 }
  0x5d   :  { %496 = vmatpush.msra.mxu2 %v1541_v44  ;;  %485 = vmatpush.msra.mxu1 %v1522_v35 }
  0x5e   :  { %400 = vmatpush.msra.mxu0 %v1655_v34  ;;  %518 = vmatpush.msra.mxu3 %v1584_v60 }
  0x5f   :  { %497 = vmatpush.msra.mxu2 %v1551_v48  ;;  %486 = vmatpush.msra.mxu1 %v1527_v38 }
  0x60   :  { %401 = vmatpush.msra.mxu0 %v1661_v37  ;;  %519 = vmatpush.msra.mxu3 %v1593_v2 }
  0x61   :  { %498 = vmatpush.msra.mxu2 %v1559_v52  ;;  %487 = vmatpush.msra.mxu1 %v1538_v42 }
  0x62   :  { %402 = vmatpush.msra.mxu0 %v1666_v39  ;;  %520 = vmatpush.msra.mxu3 %v1601_v8 }
  0x63   :  { %499 = vmatpush.msra.mxu2 %v1571_v55  ;;  %488 = vmatpush.msra.mxu1 %v1546_v46 }
  0x64   :  { %601 = vmatpush.msrb.mxu0 %v1490_v1  ;;  %521 = vmatpush.msra.mxu3 %v1607_v12 }
  0x65   :  { %500 = vmatpush.msra.mxu2 %v1578_v59  ;;  %489 = vmatpush.msra.mxu1 %v1554_v50 }
  0x66   :  { %602 = vmatpush.msrb.mxu0 %v1493_v3  ;;  %522 = vmatpush.msra.mxu3 %v1614_v16 }
  0x67   :  { %501 = vmatpush.msra.mxu2 %v1586_v62  ;;  %621 = vmatpush.msrb.mxu1 %v1525_v36 }
  0x68   :  { %603 = vmatpush.msrb.mxu0 %v1495_v5  ;;  %523 = vmatpush.msra.mxu3 %v1624_v22 }
  0x69   :  { %502 = vmatpush.msra.mxu2 %v1597_v6  ;;  %622 = vmatpush.msrb.mxu1 %v1535_v40 }
  0x6a   :  { %604 = vmatpush.msrb.mxu0 %v1498_v7  ;;  %524 = vmatpush.msra.mxu3 %v1632_v27 }
  0x6b   :  { %503 = vmatpush.msra.mxu2 %v1603_v10  ;;  %623 = vmatpush.msrb.mxu1 %v1541_v44 }
  0x6c   :  { %605 = vmatpush.msrb.mxu0 %v1501_v11  ;;  %525 = vmatpush.msra.mxu3 %v1638_v29 }
  0x6d   :  { %504 = vmatpush.msra.mxu2 %v1610_v15  ;;  %624 = vmatpush.msrb.mxu1 %v1551_v48 }
  0x6e   :  { %606 = vmatpush.msrb.mxu0 %v1504_v14  ;;  %526 = vmatpush.msra.mxu3 %v1647_v32 }
  0x6f   :  { %505 = vmatpush.msra.mxu2 %v1617_v19  ;;  %625 = vmatpush.msrb.mxu1 %v1559_v52 }
  0x70   :  { %607 = vmatpush.msrb.mxu0 %v1507_v17  ;;  %527 = vmatpush.msra.mxu3 %v1655_v34 }
  0x71   :  { %506 = vmatpush.msra.mxu2 %v1628_v25  ;;  %626 = vmatpush.msrb.mxu1 %v1571_v55 }
  0x72   :  { %608 = vmatpush.msrb.mxu0 %v1510_v20  ;;  %528 = vmatpush.msra.mxu3 %v1661_v37 }
  0x73   :  { %507 = vmatpush.msra.mxu2 %v1634_v28  ;;  %627 = vmatpush.msrb.mxu1 %v1578_v59 }
  0x74   :  { %609 = vmatpush.msrb.mxu0 %v1513_v23  ;;  %529 = vmatpush.msra.mxu3 %v1666_v39 }
  0x75   :  { %508 = vmatpush.msra.mxu2 %v1642_v31  ;;  %628 = vmatpush.msrb.mxu1 %v1586_v62 }
  0x76   :  { %610 = vmatpush.msrb.mxu0 %v1516_v26 }
  0x77   :  { %509 = vmatpush.msra.mxu2 %v1650_v33  ;;  %629 = vmatpush.msrb.mxu1 %v1597_v6 }
  0x78   :  { %611 = vmatpush.msrb.mxu0 %v1519_v30 }
  0x79   :  { %630 = vmatpush.msrb.mxu1 %v1603_v10 }
  0x7a   :  { %612 = vmatpush.msrb.mxu0 %v1522_v35 }
  0x7b   :  { %631 = vmatpush.msrb.mxu1 %v1610_v15 }
  0x7c   :  { %613 = vmatpush.msrb.mxu0 %v1527_v38 }
  0x7d   :  { %632 = vmatpush.msrb.mxu1 %v1617_v19 }
  0x7e   :  { %614 = vmatpush.msrb.mxu0 %v1538_v42 }
  0x7f   :  { %633 = vmatpush.msrb.mxu1 %v1628_v25 }
  0x80   :  { %615 = vmatpush.msrb.mxu0 %v1546_v46 }
  0x81   :  { %634 = vmatpush.msrb.mxu1 %v1634_v28 }
  0x82   :  { %616 = vmatpush.msrb.mxu0 %v1554_v50 }
  0x83   :  { %635 = vmatpush.msrb.mxu1 %v1642_v31 }
  0x85   :  { %636 = vmatpush.msrb.mxu1 %v1650_v33 }
  0xa0   :  { %v125_v41 = vpop.f32.mrf.mxu0 }
  0xa1   :  { %v1801_v56 = vadd.f32 %v125_v41, %v95_v45 }
  0xa2   :  { %v148_v57 = vpop.f32.mrf.mxu1 }
  0xa3   :  { %2279 = vst [vmem:[#allocation19_spill] sm:$0xff] %v1801_v56  ;;  %v1807_v24 = vadd.f32 %v148_v57, %v96_v4 }
  0xa5   :  { %2281 = vst [vmem:[#allocation21_spill] sm:$0xff] %v1807_v24 }
  0xa8   :  { %v128_v49 = vpop.f32.mrf.mxu0 }
  0xa9   :  { %v1799_v54 = vadd.f32 %v128_v49, %v95_v45 }
  0xab   :  { %2278 = vst [vmem:[#allocation18_spill] sm:$0xff] %v1799_v54 }
  0xaf   :  { %v245_v61 = vpop.f32.mrf.mxu3  ;;  %v151_v9 = vpop.f32.mrf.mxu1 }
  0xb0   :  { %v288_v63 = vadd.f32 %v245_v61, %v1801_v56  ;;  %v1805_v13 = vadd.f32 %v151_v9, %v96_v4 }
  0xb2   :  { %v1238_v0 = vmul.f32 -1.442695, %v288_v63  ;;  %2280 = vst [vmem:[#allocation20_spill] sm:$0xff] %v1805_v13 }
  0xb4   :  { %1262 = vpow2.f32 %v1238_v0 }
  0xba   :  { %v1263_v18 = vpop.eup %1262 }
  0xbb   :  { %v292_v21 = vadd.f32 1.0, %v1263_v18  ;;  %v1813_v18 = vld [vmem:[%s2240_s5] ss:$0 sm:$0xff] }
  0xbc   :  { %2282 = vst [vmem:[#allocation22_spill] sm:$0xff] %v1813_v18 }
  0xbd   :  { %1264 = vrcp.f32 %v292_v21  ;;  %v304_v0 = vand.u32 2147483648, %v292_v21  ;;  %vm298_vm2 = vweird.f32 %v292_v21  ;;  %v302_v9 = vand.u32 2147483647, %v292_v21 }
  0xbf   :  { %vm303_vm4 = vcmp.eq.f32.partialorder %v302_v9, 8.507059e+37 }
  0xc0   :  { %v265_v49 = vpop.f32.mrf.mxu0 }
  0xc1   :  { %v308_v41 = vadd.f32 %v265_v49, %v1807_v24 }
  0xc3   :  { %v1265_v45 = vpop.eup %1264  ;;  %v1239_v54 = vmul.f32 -1.442695, %v308_v41  ;;  %v285_v4 = vpop.f32.mrf.mxu1  ;;  %v305_v41 = vor.u32 1.1754944e-38, %v304_v0 }
  0xc4   :  { %v294_v33 = vmul.f32 %v1265_v45, %v292_v21  ;;  %vm299_vm1 = vweird.f32 %v1265_v45 }
  0xc5   :  { %1266 = vpow2.f32 %v1239_v54  ;;  %vm300_vm3 = vmor %vm298_vm2, %vm299_vm1  ;;  %v2256_v54 = vperm.slane %v1796_v43, 2 }
  0xc6   :  { %v295_v61 = vsub.f32 1.0, %v294_v33  ;;  %v331_v33 = vadd.f32 %v1813_v18, %v285_v4  ;;  %v1822_v18 = vpop.permute.xlu0 %341 }
  0xc8   :  { %v296_v63 = vmul.f32 %v1265_v45, %v295_v61 }
  0xca   :  { %v297_v56 = vadd.f32 %v1265_v45, %v296_v63  ;;  %v171_v63 = vpop.f32.mrf.mxu2 }
  0xcb   :  { %v1267_v57 = vpop.eup %1266  ;;  %v1819_v24 = vadd.f32 %v171_v63, %v2256_v54 }
  0xcc   :  { %v312_v49 = vadd.f32 1.0, %v1267_v57  ;;  %v301_v13 = vsel %vm300_vm3, %v1265_v45, %v297_v56 }
  0xcd   :  { %v306_v61 = vsel %vm303_vm4, %v305_v41, %v301_v13 }
  0xce   :  { %1268 = vrcp.f32 %v312_v49  ;;  %v332_v21 = vmul.f32 %v331_v33, %v306_v61  ;;  %v324_v56 = vand.u32 2147483648, %v312_v49  ;;  %v322_v0 = vand.u32 2147483647, %v312_v49 }
  0xcf   :  { %vm318_vm6 = vweird.f32 %v312_v49 }
  0xd0   :  { %v333_v31 = vadd.f32 %v332_v21, %v1819_v24  ;;  %v325_v13 = vor.u32 1.1754944e-38, %v324_v56  ;;  %vm323_vm8 = vcmp.eq.f32.partialorder %v322_v0, 8.507059e+37  ;;  %v2288_v0 = vld [vmem:[#allocation19_spill] sm:$0xff] }
  0xd2   :  { %1270 = vtanh.f32 %v333_v31  ;;  %v2284_v31 = vld [vmem:[#allocation16_spill] sm:$0xff] }
  0xd4   :  { %v1269_v50 = vpop.eup %1268 }
  0xd5   :  { %v314_v39 = vmul.f32 %v1269_v50, %v312_v49  ;;  %vm319_vm5 = vweird.f32 %v1269_v50  ;;  %v2286_v49 = vld [vmem:[#allocation13_spill] sm:$0xff] }
  0xd6   :  { %vm320_vm7 = vmor %vm318_vm6, %vm319_vm5 }
  0xd7   :  { %v315_v57 = vsub.f32 1.0, %v314_v39 }
  0xd8   :  { %v1271_v61 = vpop.eup %1270 }
  0xd9   :  { %v316_v45 = vmul.f32 %v1269_v50, %v315_v57 }
  0xdb   :  { %v317_v9 = vadd.f32 %v1269_v50, %v316_v45 }
  0xdd   :  { %v321_v4 = vsel %vm320_vm7, %v1269_v50, %v317_v9  ;;  %v2283_v50 = vld [vmem:[#allocation12_spill] sm:$0xff] }
  0xde   :  { %v326_v41 = vsel %vm323_vm8, %v325_v13, %v321_v4  ;;  %v2289_v13 = vld [vmem:[#allocation21_spill] sm:$0xff] }
  0xdf   :  { %v335_v33 = vsub.f32 1.0, %v326_v41  ;;  %v337_v54 = vmul.f32 0.0, %v326_v41 }
  0xe1   :  { %v336_v63 = vmul.f32 %v1271_v61, %v335_v33 }
  0xe3   :  { %v338_v43 = vadd.f32 %v337_v54, %v336_v63  ;;  %v1882_v54 = vpop.f32.mrf.mxu2 }
  0xe4   :  { %2287 = vst [vmem:[#allocation23_spill] sm:$0xff] %v1882_v54 }
  0xe5   :  { %v1825_v39 = vmul.f32 %v1822_v18, %v338_v43  ;;  %v2285_v43 = vld [vmem:[#allocation10_spill] sm:$0xff] }
  0xe7   :  { %346 = vst [vmem:[%s2241_s6] sm:$0x3] %v1825_v39  ;;  %363 = vmatmul.f32.vlgmr.msrb.gmra.mxu2 %v1825_v39  ;;  %383 = vmatmul.f32.vlgmr.msrb.gmra.mxu3 %v1825_v39 }
  0xe8   :  { %403 = vmatmul.f32.vlgmr.msra.gmra.mxu0 %v1825_v39  ;;  %641 = vmatpush.msrb.mxu2 %v1548_v47 }
  0xe9   :  { %728 = vmatpush.msrb.mxu3 %v1490_v1  ;;  %748 = vmatpush.msra.mxu0 %v1525_v36 }
  0xea   :  { %642 = vmatpush.msrb.mxu2 %v1556_v51 }
  0xeb   :  { %729 = vmatpush.msrb.mxu3 %v1493_v3  ;;  %749 = vmatpush.msra.mxu0 %v1535_v40 }
  0xec   :  { %643 = vmatpush.msrb.mxu2 %v1563_v53 }
  0xed   :  { %730 = vmatpush.msrb.mxu3 %v1495_v5  ;;  %750 = vmatpush.msra.mxu0 %v1541_v44 }
  0xee   :  { %644 = vmatpush.msrb.mxu2 %v1576_v58 }
  0xef   :  { %731 = vmatpush.msrb.mxu3 %v1498_v7  ;;  %751 = vmatpush.msra.mxu0 %v1551_v48 }
  0xf0   :  { %645 = vmatpush.msrb.mxu2 %v1584_v60 }
  0xf1   :  { %732 = vmatpush.msrb.mxu3 %v1501_v11  ;;  %752 = vmatpush.msra.mxu0 %v1559_v52 }
  0xf2   :  { %646 = vmatpush.msrb.mxu2 %v1593_v2 }
  0xf3   :  { %733 = vmatpush.msrb.mxu3 %v1504_v14  ;;  %753 = vmatpush.msra.mxu0 %v1571_v55 }
  0xf4   :  { %647 = vmatpush.msrb.mxu2 %v1601_v8 }
  0xf5   :  { %734 = vmatpush.msrb.mxu3 %v1507_v17  ;;  %754 = vmatpush.msra.mxu0 %v1578_v59 }
  0xf6   :  { %648 = vmatpush.msrb.mxu2 %v1607_v12 }
  0xf7   :  { %735 = vmatpush.msrb.mxu3 %v1510_v20  ;;  %755 = vmatpush.msra.mxu0 %v1586_v62 }
  0xf8   :  { %649 = vmatpush.msrb.mxu2 %v1614_v16 }
  0xf9   :  { %736 = vmatpush.msrb.mxu3 %v1513_v23  ;;  %756 = vmatpush.msra.mxu0 %v1597_v6 }
  0xfa   :  { %650 = vmatpush.msrb.mxu2 %v1624_v22 }
  0xfb   :  { %737 = vmatpush.msrb.mxu3 %v1516_v26  ;;  %757 = vmatpush.msra.mxu0 %v1603_v10 }
  0xfc   :  { %651 = vmatpush.msrb.mxu2 %v1632_v27 }
  0xfd   :  { %738 = vmatpush.msrb.mxu3 %v1519_v30  ;;  %758 = vmatpush.msra.mxu0 %v1610_v15 }
  0xfe   :  { %652 = vmatpush.msrb.mxu2 %v1638_v29 }
  0xff   :  { %739 = vmatpush.msrb.mxu3 %v1522_v35  ;;  %759 = vmatpush.msra.mxu0 %v1617_v19 }
 0x100   :  { %653 = vmatpush.msrb.mxu2 %v1647_v32 }
 0x101   :  { %740 = vmatpush.msrb.mxu3 %v1527_v38  ;;  %760 = vmatpush.msra.mxu0 %v1628_v25 }
 0x102   :  { %654 = vmatpush.msrb.mxu2 %v1655_v34 }
 0x103   :  { %741 = vmatpush.msrb.mxu3 %v1538_v42  ;;  %761 = vmatpush.msra.mxu0 %v1634_v28 }
 0x104   :  { %655 = vmatpush.msrb.mxu2 %v1661_v37 }
 0x105   :  { %742 = vmatpush.msrb.mxu3 %v1546_v46  ;;  %762 = vmatpush.msra.mxu0 %v2283_v50 }
 0x106   :  { %656 = vmatpush.msrb.mxu2 %v2284_v31 }
 0x107   :  { %743 = vmatpush.msrb.mxu3 %v2285_v43  ;;  %763 = vmatpush.msra.mxu0 %v2286_v49 }
 0x165   :  { %v404_v46 = vpop.f32.mrf.mxu0 }
 0x16a   :  { %v364_v21 = vpop.f32.mrf.mxu2  ;;  %v384_v57 = vpop.f32.mrf.mxu3 }
 0x16b   :  { %v408_v56 = vrot.slane %v364_v21, 6  ;;  %v431_v45 = vrot.slane %v384_v57, 6 }
 0x16d   :  { %v410_v9 = vadd.f32 %v408_v56, %v2288_v0  ;;  %v433_v4 = vadd.f32 %v431_v45, %v2289_v13  ;;  %v2290_v0 = vld [vmem:[#allocation22_spill] sm:$0xff] }
 0x16e   :  { %v453_v45 = vadd.f32 %v2290_v0, %v404_v46 }
 0x16f   :  { %v1240_v41 = vmul.f32 -1.442695, %v410_v9  ;;  %v1241_v33 = vmul.f32 -1.442695, %v433_v4 }
 0x171   :  { %1272 = vpow2.f32 %v1240_v41 }
 0x172   :  { %1274 = vpow2.f32 %v1241_v33 }
 0x177   :  { %v1273_v61 = vpop.eup %1272 }
 0x178   :  { %v1275_v63 = vpop.eup %1274  ;;  %v414_v31 = vadd.f32 1.0, %v1273_v61 }
 0x179   :  { %v437_v43 = vadd.f32 1.0, %v1275_v63  ;;  %v455_v63 = vrot.slane %v453_v45, 6 }
 0x17a   :  { %1276 = vrcp.f32 %v414_v31  ;;  %v426_v37 = vand.u32 2147483648, %v414_v31  ;;  %v424_v4 = vand.u32 2147483647, %v414_v31  ;;  %vm420_vm10 = vweird.f32 %v414_v31 }
 0x17b   :  { %1278 = vrcp.f32 %v437_v43  ;;  %vm443_vm14 = vweird.f32 %v437_v43 }
 0x17c   :  { %v427_v61 = vor.u32 1.1754944e-38, %v426_v37  ;;  %vm425_vm12 = vcmp.eq.f32.partialorder %v424_v4, 8.507059e+37  ;;  %v463_v37 = vrot.slane %v1825_v39, 6 }
 0x180   :  { %v1277_v49 = vpop.eup %1276 }
 0x181   :  { %v1279_v54 = vpop.eup %1278  ;;  %v416_v50 = vmul.f32 %v1277_v49, %v414_v31  ;;  %vm421_vm9 = vweird.f32 %v1277_v49 }
 0x182   :  { %v439_v21 = vmul.f32 %v1279_v54, %v437_v43  ;;  %vm422_vm11 = vmor %vm420_vm10, %vm421_vm9  ;;  %vm444_vm13 = vweird.f32 %v1279_v54 }
 0x183   :  { %v417_v57 = vsub.f32 1.0, %v416_v50  ;;  %v449_v50 = vand.u32 2147483648, %v437_v43  ;;  %vm445_vm15 = vmor %vm443_vm14, %vm444_vm13 }
 0x184   :  { %v440_v56 = vsub.f32 1.0, %v439_v21  ;;  %v447_v21 = vand.u32 2147483647, %v437_v43 }
 0x185   :  { %v418_v9 = vmul.f32 %v1277_v49, %v417_v57 }
 0x186   :  { %v441_v41 = vmul.f32 %v1279_v54, %v440_v56  ;;  %v450_v56 = vor.u32 1.1754944e-38, %v449_v50  ;;  %vm448_vm0 = vcmp.eq.f32.partialorder %v447_v21, 8.507059e+37 }
 0x187   :  { %v419_v33 = vadd.f32 %v1277_v49, %v418_v9 }
 0x188   :  { %v442_v42 = vadd.f32 %v1279_v54, %v441_v41 }
 0x189   :  { %v423_v13 = vsel %vm422_vm11, %v1277_v49, %v419_v33 }
 0x18a   :  { %v428_v28 = vsel %vm425_vm12, %v427_v61, %v423_v13  ;;  %v446_v57 = vsel %vm445_vm15, %v1279_v54, %v442_v42 }
 0x18b   :  { %v457_v34 = vmul.f32 %v455_v63, %v428_v28  ;;  %v451_v31 = vsel %vm448_vm0, %v450_v56, %v446_v57 }
 0x18c   :  { %v460_v9 = vsub.f32 1.0, %v451_v31  ;;  %v465_v13 = vmul.f32 %v463_v37, %v451_v31 }
 0x18d   :  { %v458_v46 = vadd.f32 %v457_v34, %v1819_v24 }
 0x18f   :  { %1280 = vtanh.f32 %v458_v46 }
 0x195   :  { %v1281_v49 = vpop.eup %1280 }
 0x196   :  { %v461_v45 = vmul.f32 %v1281_v49, %v460_v9 }
 0x198   :  { %v466_v4 = vadd.f32 %v465_v13, %v461_v45 }
 0x19a   :  { %v467_v41 = vsub.f32 %v466_v4, %v463_v37 }
 0x19c   :  { %v468_v28 = vmul.f32 %v467_v41, %v1822_v18 }
 0x19e   :  { %v470_v33 = vrot.slane %v468_v28, 2 }
 0x1a0   :  { %v1891_v43 = vadd.f32 %v470_v33, %v1825_v39 }
 0x1a2   :  { %473 = vst [vmem:[%s2241_s6 + $0x2] sm:$0x3] %v1891_v43  ;;  %490 = vmatmul.f32.vlgmr.msra.gmra.mxu1 %v1891_v43  ;;  %510 = vmatmul.f32.vlgmr.msra.gmra.mxu2 %v1891_v43 }
 0x1a3   :  { %530 = vmatmul.f32.vlgmr.msra.gmra.mxu3 %v1891_v43  ;;  %768 = vmatpush.msra.mxu1 %v1548_v47 }
 0x1a4   :  { %845 = vmatpush.msra.mxu2 %v1490_v1  ;;  %865 = vmatpush.msra.mxu3 %v1525_v36  ;;  %v2291_v1 = vld [vmem:[#allocation14_spill] sm:$0xff] }
 0x1a5   :  { %769 = vmatpush.msra.mxu1 %v1556_v51 }
 0x1a6   :  { %846 = vmatpush.msra.mxu2 %v1493_v3  ;;  %866 = vmatpush.msra.mxu3 %v1535_v40  ;;  %v2292_v3 = vld [vmem:[#allocation8_spill] sm:$0xff] }
 0x1a7   :  { %770 = vmatpush.msra.mxu1 %v1563_v53 }
 0x1a8   :  { %847 = vmatpush.msra.mxu2 %v1495_v5  ;;  %867 = vmatpush.msra.mxu3 %v1541_v44  ;;  %v2293_v5 = vld [vmem:[#allocation11_spill] sm:$0xff]  ;;  %v2301_v44 = vld [vmem:[#allocation21_spill] sm:$0xff] }
 0x1a9   :  { %771 = vmatpush.msra.mxu1 %v1576_v58 }
 0x1aa   :  { %848 = vmatpush.msra.mxu2 %v1498_v7  ;;  %868 = vmatpush.msra.mxu3 %v1551_v48  ;;  %v2294_v7 = vld [vmem:[#allocation15_spill] sm:$0xff] }
 0x1ab   :  { %772 = vmatpush.msra.mxu1 %v1584_v60 }
 0x1ac   :  { %849 = vmatpush.msra.mxu2 %v1501_v11  ;;  %869 = vmatpush.msra.mxu3 %v1559_v52  ;;  %v2295_v11 = vld [vmem:[#allocation9_spill] sm:$0xff] }
 0x1ad   :  { %773 = vmatpush.msra.mxu1 %v1593_v2 }
 0x1ae   :  { %850 = vmatpush.msra.mxu2 %v1504_v14  ;;  %870 = vmatpush.msra.mxu3 %v1571_v55  ;;  %v2296_v14 = vld [vmem:[#allocation12_spill] sm:$0xff] }
 0x1af   :  { %774 = vmatpush.msra.mxu1 %v1601_v8 }
 0x1b0   :  { %851 = vmatpush.msra.mxu2 %v1507_v17  ;;  %871 = vmatpush.msra.mxu3 %v1578_v59  ;;  %v2297_v17 = vld [vmem:[#allocation16_spill] sm:$0xff] }
 0x1b1   :  { %775 = vmatpush.msra.mxu1 %v1607_v12 }
 0x1b2   :  { %852 = vmatpush.msra.mxu2 %v1510_v20  ;;  %872 = vmatpush.msra.mxu3 %v1586_v62  ;;  %v2298_v20 = vld [vmem:[#allocation10_spill] sm:$0xff] }
 0x1b3   :  { %776 = vmatpush.msra.mxu1 %v1614_v16 }
 0x1b4   :  { %853 = vmatpush.msra.mxu2 %v1513_v23  ;;  %873 = vmatpush.msra.mxu3 %v1597_v6  ;;  %v2299_v23 = vld [vmem:[#allocation13_spill] sm:$0xff] }
 0x1b5   :  { %777 = vmatpush.msra.mxu1 %v1624_v22 }
 0x1b6   :  { %854 = vmatpush.msra.mxu2 %v1516_v26  ;;  %874 = vmatpush.msra.mxu3 %v1603_v10 }
 0x1b7   :  { %778 = vmatpush.msra.mxu1 %v1632_v27 }
 0x1b8   :  { %855 = vmatpush.msra.mxu2 %v1519_v30  ;;  %875 = vmatpush.msra.mxu3 %v1610_v15 }
 0x1b9   :  { %779 = vmatpush.msra.mxu1 %v1638_v29 }
 0x1ba   :  { %856 = vmatpush.msra.mxu2 %v1522_v35  ;;  %876 = vmatpush.msra.mxu3 %v1617_v19  ;;  %v2300_v35 = vld [vmem:[#allocation19_spill] sm:$0xff] }
 0x1bb   :  { %780 = vmatpush.msra.mxu1 %v1647_v32 }
 0x1bc   :  { %857 = vmatpush.msra.mxu2 %v1527_v38  ;;  %877 = vmatpush.msra.mxu3 %v1628_v25 }
 0x1bd   :  { %781 = vmatpush.msra.mxu1 %v2291_v1 }
 0x1be   :  { %858 = vmatpush.msra.mxu2 %v2292_v3  ;;  %878 = vmatpush.msra.mxu3 %v2293_v5 }
 0x1bf   :  { %782 = vmatpush.msra.mxu1 %v2294_v7 }
 0x1c0   :  { %859 = vmatpush.msra.mxu2 %v2295_v11  ;;  %879 = vmatpush.msra.mxu3 %v2296_v14 }
 0x1c1   :  { %783 = vmatpush.msra.mxu1 %v2297_v17 }
 0x1c2   :  { %860 = vmatpush.msra.mxu2 %v2298_v20  ;;  %880 = vmatpush.msra.mxu3 %v2299_v23 }
 0x21f   :  { %v491_v26 = vpop.f32.mrf.mxu1 }
 0x220   :  { %v535_v30 = vrot.slane %v491_v26, 4 }
 0x222   :  { %v537_v36 = vadd.f32 %v535_v30, %v2300_v35  ;;  %v590_v30 = vrot.slane %v1891_v43, 4 }
 0x224   :  { %v1242_v38 = vmul.f32 -1.442695, %v537_v36 }
 0x225   :  { %v511_v40 = vpop.f32.mrf.mxu2 }
 0x226   :  { %1282 = vpow2.f32 %v1242_v38  ;;  %v558_v42 = vrot.slane %v511_v40, 4  ;;  %v531_v34 = vpop.f32.mrf.mxu3 }
 0x227   :  { %v580_v50 = vadd.f32 %v2290_v0, %v531_v34  ;;  %v1979_v34 = vld [vmem:[#allocation4 + $0x158] sm:$0xff] }
 0x228   :  { %v560_v47 = vadd.f32 %v558_v42, %v2301_v44 }
 0x229   :  { %v582_v37 = vrot.slane %v580_v50, 4  ;;  %v1995_v50 = vld [vmem:[#allocation4 + $0x128] sm:$0xff] }
 0x22a   :  { %v1243_v48 = vmul.f32 -1.442695, %v560_v47 }
 0x22c   :  { %v1283_v51 = vpop.eup %1282  ;;  %1284 = vpow2.f32 %v1243_v48 }
 0x22d   :  { %v541_v52 = vadd.f32 1.0, %v1283_v51 }
 0x22f   :  { %1286 = vrcp.f32 %v541_v52  ;;  %v553_v54 = vand.u32 2147483648, %v541_v52  ;;  %v551_v63 = vand.u32 2147483647, %v541_v52  ;;  %vm547_vm2 = vweird.f32 %v541_v52 }
 0x231   :  { %v554_v56 = vor.u32 1.1754944e-38, %v553_v54  ;;  %vm552_vm4 = vcmp.eq.f32.partialorder %v551_v63, 8.507059e+37  ;;  %v1985_v54 = vld [vmem:[#allocation4 + $0x138] sm:$0xff]  ;;  %v1992_v63 = vld [vmem:[#allocation4 + $0x120] sm:$0xff] }
 0x232   :  { %v1285_v53 = vpop.eup %1284 }
 0x233   :  { %v564_v55 = vadd.f32 1.0, %v1285_v53  ;;  %v1964_v53 = vld [vmem:[#allocation4 + $0x178] sm:$0xff] }
 0x235   :  { %v1287_v59 = vpop.eup %1286  ;;  %1288 = vrcp.f32 %v564_v55  ;;  %v576_v13 = vand.u32 2147483648, %v564_v55  ;;  %v574_v41 = vand.u32 2147483647, %v564_v55  ;;  %vm570_vm6 = vweird.f32 %v564_v55 }
 0x236   :  { %v543_v62 = vmul.f32 %v1287_v59, %v541_v52  ;;  %vm548_vm1 = vweird.f32 %v1287_v59 }
 0x237   :  { %vm549_vm3 = vmor %vm547_vm2, %vm548_vm1  ;;  %v577_v3 = vor.u32 1.1754944e-38, %v576_v13  ;;  %vm575_vm8 = vcmp.eq.f32.partialorder %v574_v41, 8.507059e+37 }
 0x238   :  { %v544_v39 = vsub.f32 1.0, %v543_v62  ;;  %v1976_v62 = vld [vmem:[#allocation4 + $0x150] sm:$0xff] }
 0x23a   :  { %v545_v61 = vmul.f32 %v1287_v59, %v544_v39  ;;  %v1982_v39 = vld [vmem:[#allocation4 + $0x148] sm:$0xff] }
 0x23b   :  { %v1289_v21 = vpop.eup %1288 }
 0x23c   :  { %v566_v46 = vmul.f32 %v1289_v21, %v564_v55  ;;  %v546_v57 = vadd.f32 %v1287_v59, %v545_v61  ;;  %vm571_vm5 = vweird.f32 %v1289_v21  ;;  %v1967_v55 = vld [vmem:[#allocation4 + $0x168] sm:$0xff]  ;;  %v1988_v61 = vld [vmem:[#allocation4 + $0x140] sm:$0xff] }
 0x23d   :  { %vm572_vm7 = vmor %vm570_vm6, %vm571_vm5 }
 0x23e   :  { %v567_v31 = vsub.f32 1.0, %v566_v46  ;;  %v550_v9 = vsel %vm549_vm3, %v1287_v59, %v546_v57  ;;  %v1973_v59 = vld [vmem:[#allocation4 + $0x160] sm:$0xff]  ;;  %v2002_v46 = vld [vmem:[#allocation4 + $0x110] sm:$0xff]  ;;  %v2009_v57 = vld [vmem:[#allocation4 + $0xf8] sm:$0xff] }
 0x23f   :  { %v555_v49 = vsel %vm552_vm4, %v554_v56, %v550_v9  ;;  %v2016_v56 = vld [vmem:[#allocation4 + $0xe0] sm:$0xff]  ;;  %v2032_v9 = vld [vmem:[#allocation4 + $0x90] sm:$0xff] }
 0x240   :  { %v568_v45 = vmul.f32 %v1289_v21, %v567_v31  ;;  %v584_v4 = vmul.f32 %v582_v37, %v555_v49  ;;  %v2023_v31 = vld [vmem:[#allocation4 + $0xc8] sm:$0xff] }
 0x242   :  { %v569_v28 = vadd.f32 %v1289_v21, %v568_v45  ;;  %v585_v33 = vadd.f32 %v584_v4, %v1819_v24 }
 0x244   :  { %v573_v11 = vsel %vm572_vm7, %v1289_v21, %v569_v28  ;;  %1290 = vtanh.f32 %v585_v33  ;;  %v1999_v21 = vld [vmem:[#allocation4 + $0x108] sm:$0xff] }
 0x245   :  { %v578_v20 = vsel %vm575_vm8, %v577_v3, %v573_v11 }
 0x246   :  { %v587_v26 = vsub.f32 1.0, %v578_v20  ;;  %v592_v40 = vmul.f32 %v590_v30, %v578_v20 }
 0x24a   :  { %v1291_v36 = vpop.eup %1290 }
 0x24b   :  { %v588_v38 = vmul.f32 %v1291_v36, %v587_v26 }
 0x24d   :  { %v593_v42 = vadd.f32 %v592_v40, %v588_v38 }
 0x24f   :  { %v594_v47 = vsub.f32 %v593_v42, %v590_v30 }
 0x251   :  { %v595_v48 = vmul.f32 %v594_v47, %v1822_v18 }
 0x253   :  { %v597_v51 = vrot.slane %v595_v48, 4 }
 0x255   :  { %v1955_v52 = vadd.f32 %v597_v51, %v1891_v43  ;;  %v1970_v43 = vld [vmem:[#allocation4 + $0x170] sm:$0xff] }
 0x257   :  { %600 = vst [vmem:[%s2241_s6 + $0x4] sm:$0x3] %v1955_v52  ;;  %617 = vmatmul.f32.vlgmr.msrb.gmra.mxu0 %v1955_v52  ;;  %637 = vmatmul.f32.vlgmr.msrb.gmra.mxu1 %v1955_v52 }
 0x258   :  { %657 = vmatmul.f32.vlgmr.msrb.gmra.mxu2 %v1955_v52  ;;  %885 = vmatpush.msrb.mxu0 %v1964_v53 }
 0x259   :  { %972 = vmatpush.msrb.mxu1 %v1967_v55  ;;  %992 = vmatpush.msrb.mxu2 %v1970_v43 }
 0x25a   :  { %886 = vmatpush.msrb.mxu0 %v1973_v59 }
 0x25b   :  { %973 = vmatpush.msrb.mxu1 %v1976_v62  ;;  %993 = vmatpush.msrb.mxu2 %v1979_v34 }
 0x25c   :  { %887 = vmatpush.msrb.mxu0 %v1982_v39 }
 0x25d   :  { %974 = vmatpush.msrb.mxu1 %v1985_v54  ;;  %994 = vmatpush.msrb.mxu2 %v1988_v61 }
 0x25e   :  { %888 = vmatpush.msrb.mxu0 %v1576_v58  ;;  %v2006_v58 = vld [vmem:[#allocation4 + $0xf0] sm:$0xff] }
 0x25f   :  { %975 = vmatpush.msrb.mxu1 %v1992_v63  ;;  %995 = vmatpush.msrb.mxu2 %v1995_v50 }
 0x260   :  { %889 = vmatpush.msrb.mxu0 %v1584_v60  ;;  %v2013_v60 = vld [vmem:[#allocation4 + $0xd8] sm:$0xff] }
 0x261   :  { %976 = vmatpush.msrb.mxu1 %v1999_v21  ;;  %996 = vmatpush.msrb.mxu2 %v2002_v46 }
 0x262   :  { %890 = vmatpush.msrb.mxu0 %v1593_v2  ;;  %v2020_v2 = vld [vmem:[#allocation4 + $0xc0] sm:$0xff] }
 0x263   :  { %977 = vmatpush.msrb.mxu1 %v2006_v58  ;;  %997 = vmatpush.msrb.mxu2 %v2009_v57 }
 0x264   :  { %891 = vmatpush.msrb.mxu0 %v1601_v8  ;;  %v2027_v8 = vld [vmem:[#allocation4 + $0xa8] sm:$0xff] }
 0x265   :  { %978 = vmatpush.msrb.mxu1 %v2013_v60  ;;  %998 = vmatpush.msrb.mxu2 %v2016_v56 }
 0x266   :  { %892 = vmatpush.msrb.mxu0 %v1607_v12  ;;  %v2037_v12 = vld [vmem:[#allocation4 + $0x78] sm:$0xff] }
 0x267   :  { %979 = vmatpush.msrb.mxu1 %v2020_v2  ;;  %999 = vmatpush.msrb.mxu2 %v2023_v31 }
 0x268   :  { %893 = vmatpush.msrb.mxu0 %v1614_v16  ;;  %v2042_v16 = vld [vmem:[#allocation4 + $0x60] sm:$0xff] }
 0x269   :  { %980 = vmatpush.msrb.mxu1 %v2027_v8  ;;  %1000 = vmatpush.msrb.mxu2 %v1597_v6  ;;  %v2047_v6 = vld [vmem:[#allocation4 + $0x48] sm:$0xff] }
 0x26a   :  { %894 = vmatpush.msrb.mxu0 %v1624_v22 }
 0x26b   :  { %981 = vmatpush.msrb.mxu1 %v2032_v9  ;;  %1001 = vmatpush.msrb.mxu2 %v1603_v10  ;;  %v2052_v10 = vld [vmem:[#allocation4 + $0x30] sm:$0xff] }
 0x26c   :  { %895 = vmatpush.msrb.mxu0 %v1632_v27 }
 0x26d   :  { %982 = vmatpush.msrb.mxu1 %v2037_v12  ;;  %1002 = vmatpush.msrb.mxu2 %v1610_v15  ;;  %v2057_v15 = vld [vmem:[#allocation4 + $0x18] sm:$0xff] }
 0x26e   :  { %896 = vmatpush.msrb.mxu0 %v1638_v29 }
 0x26f   :  { %983 = vmatpush.msrb.mxu1 %v2042_v16  ;;  %1003 = vmatpush.msrb.mxu2 %v1617_v19  ;;  %v2062_v19 = vld [vmem:[#allocation4] sm:$0xff] }
 0x270   :  { %897 = vmatpush.msrb.mxu0 %v1647_v32 }
 0x271   :  { %984 = vmatpush.msrb.mxu1 %v2047_v6  ;;  %1004 = vmatpush.msrb.mxu2 %v1628_v25 }
 0x272   :  { %898 = vmatpush.msrb.mxu0 %v2291_v1 }
 0x273   :  { %985 = vmatpush.msrb.mxu1 %v2052_v10  ;;  %1005 = vmatpush.msrb.mxu2 %v2293_v5 }
 0x274   :  { %899 = vmatpush.msrb.mxu0 %v2294_v7 }
 0x275   :  { %986 = vmatpush.msrb.mxu1 %v2057_v15  ;;  %1006 = vmatpush.msrb.mxu2 %v2296_v14 }
 0x276   :  { %900 = vmatpush.msrb.mxu0 %v2297_v17 }
 0x277   :  { %987 = vmatpush.msrb.mxu1 %v2062_v19  ;;  %1007 = vmatpush.msrb.mxu2 %v2299_v23 }
 0x2d4   :  { %v618_v22 = vpop.f32.mrf.mxu0  ;;  %v638_v25 = vpop.f32.mrf.mxu1 }
 0x2d5   :  { %v662_v27 = vrot.slane %v618_v22, 2  ;;  %v685_v29 = vrot.slane %v638_v25, 2 }
 0x2d7   :  { %v664_v32 = vadd.f32 %v662_v27, %v2300_v35  ;;  %v687_v1 = vadd.f32 %v685_v29, %v2301_v44 }
 0x2d9   :  { %v1244_v5 = vmul.f32 -1.442695, %v664_v32  ;;  %v1245_v7 = vmul.f32 -1.442695, %v687_v1  ;;  %v717_v1 = vrot.slane %v1955_v52, 2 }
 0x2db   :  { %1292 = vpow2.f32 %v1244_v5  ;;  %v658_v41 = vpop.f32.mrf.mxu2 }
 0x2dc   :  { %1294 = vpow2.f32 %v1245_v7  ;;  %v707_v11 = vadd.f32 %v2290_v0, %v658_v41 }
 0x2de   :  { %v709_v38 = vrot.slane %v707_v11, 2 }
 0x2e1   :  { %v1293_v14 = vpop.eup %1292 }
 0x2e2   :  { %v1295_v17 = vpop.eup %1294  ;;  %v668_v37 = vadd.f32 1.0, %v1293_v14 }
 0x2e3   :  { %v691_v49 = vadd.f32 1.0, %v1295_v17 }
 0x2e4   :  { %1296 = vrcp.f32 %v668_v37  ;;  %v680_v35 = vand.u32 2147483648, %v668_v37  ;;  %v678_v44 = vand.u32 2147483647, %v668_v37  ;;  %vm674_vm10 = vweird.f32 %v668_v37 }
 0x2e5   :  { %1298 = vrcp.f32 %v691_v49  ;;  %v703_v47 = vand.u32 2147483648, %v691_v49  ;;  %vm697_vm14 = vweird.f32 %v691_v49  ;;  %v701_v51 = vand.u32 2147483647, %v691_v49 }
 0x2e6   :  { %v681_v30 = vor.u32 1.1754944e-38, %v680_v35  ;;  %vm679_vm12 = vcmp.eq.f32.partialorder %v678_v44, 8.507059e+37 }
 0x2e7   :  { %v704_v27 = vor.u32 1.1754944e-38, %v703_v47  ;;  %vm702_vm0 = vcmp.eq.f32.partialorder %v701_v51, 8.507059e+37 }
 0x2ea   :  { %v1297_v45 = vpop.eup %1296 }
 0x2eb   :  { %v1299_v23 = vpop.eup %1298  ;;  %v670_v13 = vmul.f32 %v1297_v45, %v668_v37  ;;  %vm675_vm9 = vweird.f32 %v1297_v45 }
 0x2ec   :  { %v693_v4 = vmul.f32 %v1299_v23, %v691_v49  ;;  %vm676_vm11 = vmor %vm674_vm10, %vm675_vm9  ;;  %vm698_vm13 = vweird.f32 %v1299_v23 }
 0x2ed   :  { %v671_v28 = vsub.f32 1.0, %v670_v13  ;;  %vm699_vm15 = vmor %vm697_vm14, %vm698_vm13 }
 0x2ee   :  { %v694_v33 = vsub.f32 1.0, %v693_v4  ;;  %v2303_v4 = vld [vmem:[#allocation18_spill] sm:$0xff] }
 0x2ef   :  { %v672_v3 = vmul.f32 %v1297_v45, %v671_v28 }
 0x2f0   :  { %v695_v20 = vmul.f32 %v1299_v23, %v694_v33 }
 0x2f1   :  { %v673_v26 = vadd.f32 %v1297_v45, %v672_v3 }
 0x2f2   :  { %v696_v42 = vadd.f32 %v1299_v23, %v695_v20 }
 0x2f3   :  { %v677_v36 = vsel %vm676_vm11, %v1297_v45, %v673_v26 }
 0x2f4   :  { %v682_v40 = vsel %vm679_vm12, %v681_v30, %v677_v36  ;;  %v700_v25 = vsel %vm699_vm15, %v1299_v23, %v696_v42 }
 0x2f5   :  { %v711_v48 = vmul.f32 %v709_v38, %v682_v40  ;;  %v705_v29 = vsel %vm702_vm0, %v704_v27, %v700_v25 }
 0x2f6   :  { %v714_v32 = vsub.f32 1.0, %v705_v29  ;;  %v719_v14 = vmul.f32 %v717_v1, %v705_v29 }
 0x2f7   :  { %v712_v22 = vadd.f32 %v711_v48, %v1819_v24  ;;  %v2091_v24 = vld [vmem:[#allocation4 + $0x130] sm:$0xff] }
 0x2f9   :  { %1300 = vtanh.f32 %v712_v22 }
 0x2ff   :  { %v1301_v5 = vpop.eup %1300 }
 0x300   :  { %v715_v7 = vmul.f32 %v1301_v5, %v714_v32  ;;  %v2304_v32 = vld [vmem:[#allocation17_spill] sm:$0xff]  ;;  %v2306_v5 = vld [vmem:[#allocation23_spill] sm:$0xff] }
 0x302   :  { %v720_v17 = vadd.f32 %v719_v14, %v715_v7 }
 0x304   :  { %v721_v37 = vsub.f32 %v720_v17, %v717_v1  ;;  %v2305_v1 = vperm.slane %v2304_v32, 2 }
 0x306   :  { %v722_v45 = vmul.f32 %v721_v37, %v1822_v18  ;;  %v2096_v18 = vld [vmem:[#allocation4 + $0x118] sm:$0xff]  ;;  %v2154_v7 = vadd.f32 %v2306_v5, %v2305_v1 }
 0x308   :  { %v724_v13 = vrot.slane %v722_v45, 6 }
 0x30a   :  { %v2073_v49 = vadd.f32 %v724_v13, %v1955_v52  ;;  %v2101_v52 = vld [vmem:[#allocation4 + $0x100] sm:$0xff] }
 0x30c   :  { %727 = vst [vmem:[%s2241_s6 + $0x6] sm:$0x3] %v2073_v49  ;;  %744 = vmatmul.f32.vlgmr.msrb.gmra.mxu3 %v2073_v49  ;;  %764 = vmatmul.f32.vlgmr.msra.gmra.mxu0 %v2073_v49 }
 0x30d   :  { %784 = vmatmul.f32.vlgmr.msra.gmra.mxu1 %v2073_v49  ;;  %1012 = vmatpush.msrb.mxu3 %v1964_v53 }
 0x30e   :  { %1099 = vmatpush.msra.mxu0 %v1967_v55  ;;  %1119 = vmatpush.msra.mxu1 %v1970_v43  ;;  %v2106_v55 = vld [vmem:[#allocation4 + $0xe8] sm:$0xff]  ;;  %v2111_v43 = vld [vmem:[#allocation4 + $0xd0] sm:$0xff] }
 0x30f   :  { %1013 = vmatpush.msrb.mxu3 %v1973_v59 }
 0x310   :  { %1100 = vmatpush.msra.mxu0 %v1976_v62  ;;  %1120 = vmatpush.msra.mxu1 %v1979_v34  ;;  %v2116_v62 = vld [vmem:[#allocation4 + $0xb8] sm:$0xff]  ;;  %v1375_v34 = vld [vmem:[#allocation4 + $0xb0] sm:$0xff] }
 0x311   :  { %1014 = vmatpush.msrb.mxu3 %v1982_v39 }
 0x312   :  { %1101 = vmatpush.msra.mxu0 %v1985_v54  ;;  %1121 = vmatpush.msra.mxu1 %v1988_v61  ;;  %v2120_v54 = vld [vmem:[#allocation4 + $0xa0] sm:$0xff]  ;;  %v1377_v61 = vld [vmem:[#allocation4 + $0x98] sm:$0xff] }
 0x313   :  { %1015 = vmatpush.msrb.mxu3 %v2091_v24 }
 0x314   :  { %1102 = vmatpush.msra.mxu0 %v1992_v63  ;;  %1122 = vmatpush.msra.mxu1 %v1995_v50  ;;  %v2124_v63 = vld [vmem:[#allocation4 + $0x88] sm:$0xff]  ;;  %v1379_v50 = vld [vmem:[#allocation4 + $0x80] sm:$0xff] }
 0x315   :  { %1016 = vmatpush.msrb.mxu3 %v2096_v18 }
 0x316   :  { %1103 = vmatpush.msra.mxu0 %v1999_v21  ;;  %1123 = vmatpush.msra.mxu1 %v2002_v46  ;;  %v2128_v21 = vld [vmem:[#allocation4 + $0x70] sm:$0xff]  ;;  %v1381_v46 = vld [vmem:[#allocation4 + $0x68] sm:$0xff] }
 0x317   :  { %1017 = vmatpush.msrb.mxu3 %v2101_v52 }
 0x318   :  { %1104 = vmatpush.msra.mxu0 %v2006_v58  ;;  %1124 = vmatpush.msra.mxu1 %v2009_v57  ;;  %v2132_v58 = vld [vmem:[#allocation4 + $0x58] sm:$0xff]  ;;  %v1383_v57 = vld [vmem:[#allocation4 + $0x50] sm:$0xff] }
 0x319   :  { %1018 = vmatpush.msrb.mxu3 %v2106_v55 }
 0x31a   :  { %1105 = vmatpush.msra.mxu0 %v2013_v60  ;;  %1125 = vmatpush.msra.mxu1 %v2016_v56  ;;  %v2136_v60 = vld [vmem:[#allocation4 + $0x40] sm:$0xff]  ;;  %v1385_v56 = vld [vmem:[#allocation4 + $0x38] sm:$0xff] }
 0x31b   :  { %1019 = vmatpush.msrb.mxu3 %v2111_v43 }
 0x31c   :  { %1106 = vmatpush.msra.mxu0 %v2020_v2  ;;  %1126 = vmatpush.msra.mxu1 %v2023_v31  ;;  %v2140_v2 = vld [vmem:[#allocation4 + $0x28] sm:$0xff]  ;;  %v1387_v31 = vld [vmem:[#allocation4 + $0x20] sm:$0xff] }
 0x31d   :  { %1020 = vmatpush.msrb.mxu3 %v2116_v62 }
 0x31e   :  { %1107 = vmatpush.msra.mxu0 %v2027_v8  ;;  %1127 = vmatpush.msra.mxu1 %v1375_v34  ;;  %v2144_v8 = vld [vmem:[#allocation4 + $0x10] sm:$0xff] }
 0x31f   :  { %1021 = vmatpush.msrb.mxu3 %v2120_v54 }
 0x320   :  { %1108 = vmatpush.msra.mxu0 %v2032_v9  ;;  %1128 = vmatpush.msra.mxu1 %v1377_v61  ;;  %v1389_v9 = vld [vmem:[#allocation4 + $0x8] sm:$0xff] }
 0x321   :  { %1022 = vmatpush.msrb.mxu3 %v2124_v63 }
 0x322   :  { %1109 = vmatpush.msra.mxu0 %v2037_v12  ;;  %1129 = vmatpush.msra.mxu1 %v1379_v50 }
 0x323   :  { %1023 = vmatpush.msrb.mxu3 %v2128_v21 }
 0x324   :  { %1110 = vmatpush.msra.mxu0 %v2042_v16  ;;  %1130 = vmatpush.msra.mxu1 %v1381_v46  ;;  %v2302_v16 = vld [vmem:[#allocation20_spill] sm:$0xff] }
 0x325   :  { %1024 = vmatpush.msrb.mxu3 %v2132_v58 }
 0x326   :  { %1111 = vmatpush.msra.mxu0 %v2047_v6  ;;  %1131 = vmatpush.msra.mxu1 %v1383_v57 }
 0x327   :  { %1025 = vmatpush.msrb.mxu3 %v2136_v60 }
 0x328   :  { %1112 = vmatpush.msra.mxu0 %v2052_v10  ;;  %1132 = vmatpush.msra.mxu1 %v1385_v56 }
 0x329   :  { %1026 = vmatpush.msrb.mxu3 %v2140_v2 }
 0x32a   :  { %1113 = vmatpush.msra.mxu0 %v2057_v15  ;;  %1133 = vmatpush.msra.mxu1 %v1387_v31 }
 0x32b   :  { %1027 = vmatpush.msrb.mxu3 %v2144_v8 }
 0x32c   :  { %1114 = vmatpush.msra.mxu0 %v2062_v19  ;;  %1134 = vmatpush.msra.mxu1 %v1389_v9  ;;  %v2159_v9 = vpop.permute.xlu0 %839 }
 0x389   :  { %v765_v12 = vpop.f32.mrf.mxu0 }
 0x38a   :  { %v808_v6 = vadd.f32 %v765_v12, %v2302_v16  ;;  %v785_v47 = vpop.f32.mrf.mxu1 }
 0x38b   :  { %v828_v22 = vadd.f32 %v2290_v0, %v785_v47 }
 0x38c   :  { %v1247_v10 = vmul.f32 -1.442695, %v808_v6 }
 0x38e   :  { %1302 = vpow2.f32 %v1247_v10 }
 0x38f   :  { %v745_v23 = vpop.f32.mrf.mxu3 }
 0x390   :  { %v788_v41 = vadd.f32 %v745_v23, %v2303_v4 }
 0x392   :  { %v1246_v28 = vmul.f32 -1.442695, %v788_v41 }
 0x394   :  { %v1303_v15 = vpop.eup %1302  ;;  %1304 = vpow2.f32 %v1246_v28  ;;  %v2193_v28 = vld [vmem:[%s2240_s5] ss:$0 sm:$0xff] }
 0x395   :  { %v812_v33 = vadd.f32 1.0, %v1303_v15 }
 0x397   :  { %1306 = vrcp.f32 %v812_v33  ;;  %v824_v14 = vand.u32 2147483648, %v812_v33  ;;  %vm818_vm6 = vweird.f32 %v812_v33  ;;  %v822_v37 = vand.u32 2147483647, %v812_v33 }
 0x399   :  { %v825_v34 = vor.u32 1.1754944e-38, %v824_v14  ;;  %vm823_vm8 = vcmp.eq.f32.partialorder %v822_v37, 8.507059e+37 }
 0x39a   :  { %v1305_v35 = vpop.eup %1304 }
 0x39b   :  { %v792_v3 = vadd.f32 1.0, %v1305_v35 }
 0x39d   :  { %1308 = vrcp.f32 %v792_v3  ;;  %v1307_v44 = vpop.eup %1306  ;;  %v804_v36 = vand.u32 2147483648, %v792_v3  ;;  %v802_v40 = vand.u32 2147483647, %v792_v3  ;;  %vm798_vm2 = vweird.f32 %v792_v3 }
 0x39e   :  { %v814_v19 = vmul.f32 %v1307_v44, %v812_v33  ;;  %vm819_vm5 = vweird.f32 %v1307_v44 }
 0x39f   :  { %v805_v51 = vor.u32 1.1754944e-38, %v804_v36  ;;  %vm803_vm4 = vcmp.eq.f32.partialorder %v802_v40, 8.507059e+37  ;;  %vm820_vm7 = vmor %vm818_vm6, %vm819_vm5 }
 0x3a0   :  { %v815_v26 = vsub.f32 1.0, %v814_v19 }
 0x3a2   :  { %v816_v42 = vmul.f32 %v1307_v44, %v815_v26 }
 0x3a3   :  { %v1309_v11 = vpop.eup %1308 }
 0x3a4   :  { %v794_v20 = vmul.f32 %v1309_v11, %v792_v3  ;;  %vm799_vm1 = vweird.f32 %v1309_v11  ;;  %v817_v27 = vadd.f32 %v1307_v44, %v816_v42 }
 0x3a5   :  { %vm800_vm3 = vmor %vm798_vm2, %vm799_vm1 }
 0x3a6   :  { %v795_v30 = vsub.f32 1.0, %v794_v20  ;;  %v821_v13 = vsel %vm820_vm7, %v1307_v44, %v817_v27 }
 0x3a7   :  { %v826_v0 = vsel %vm823_vm8, %v825_v34, %v821_v13 }
 0x3a8   :  { %v796_v38 = vmul.f32 %v1309_v11, %v795_v30  ;;  %v832_v61 = vsub.f32 1.0, %v826_v0  ;;  %v834_v46 = vmul.f32 %v826_v0, %v2073_v49 }
 0x3aa   :  { %v797_v48 = vadd.f32 %v1309_v11, %v796_v38 }
 0x3ac   :  { %v801_v25 = vsel %vm800_vm3, %v1309_v11, %v797_v48 }
 0x3ad   :  { %v806_v29 = vsel %vm803_vm4, %v805_v51, %v801_v25 }
 0x3ae   :  { %v829_v17 = vmul.f32 %v828_v22, %v806_v29 }
 0x3b0   :  { %v830_v45 = vadd.f32 %v829_v17, %v2154_v7 }
 0x3b2   :  { %1310 = vtanh.f32 %v830_v45 }
 0x3b8   :  { %v1311_v50 = vpop.eup %1310 }
 0x3b9   :  { %v833_v57 = vmul.f32 %v1311_v50, %v832_v61 }
 0x3bb   :  { %v835_v56 = vadd.f32 %v834_v46, %v833_v57 }
 0x3bd   :  { %v836_v31 = vsub.f32 %v835_v56, %v2073_v49 }
 0x3bf   :  { %v842_v12 = vmul.f32 %v2159_v9, %v836_v31 }
 0x3c1   :  { %v2163_v6 = vadd.f32 %v842_v12, %v2073_v49 }
 0x3c3   :  { %844 = vst [vmem:[%s2241_s6 + $0x8] sm:$0x3] %v2163_v6  ;;  %861 = vmatmul.f32.vlgmr.msra.gmra.mxu2 %v2163_v6  ;;  %881 = vmatmul.f32.vlgmr.msra.gmra.mxu3 %v2163_v6  ;;  %v961_v25 = vrot.slane %v2163_v6, 6 }
 0x3c4   :  { %901 = vmatmul.f32.vlgmr.msrb.gmra.mxu0 %v2163_v6  ;;  %1139 = vmatpush.msra.mxu2 %v1964_v53 }
 0x3c6   :  { %1140 = vmatpush.msra.mxu2 %v1973_v59 }
 0x3c8   :  { %1141 = vmatpush.msra.mxu2 %v1982_v39 }
 0x3ca   :  { %1142 = vmatpush.msra.mxu2 %v2091_v24 }
 0x3cc   :  { %1143 = vmatpush.msra.mxu2 %v2096_v18 }
 0x3ce   :  { %1144 = vmatpush.msra.mxu2 %v2101_v52 }
 0x3d0   :  { %1145 = vmatpush.msra.mxu2 %v2106_v55 }
 0x3d2   :  { %1146 = vmatpush.msra.mxu2 %v2111_v43 }
 0x3d4   :  { %1147 = vmatpush.msra.mxu2 %v2116_v62 }
 0x3d6   :  { %1148 = vmatpush.msra.mxu2 %v2120_v54 }
 0x3d8   :  { %1149 = vmatpush.msra.mxu2 %v2124_v63 }
 0x3da   :  { %1150 = vmatpush.msra.mxu2 %v2128_v21 }
 0x3dc   :  { %1151 = vmatpush.msra.mxu2 %v2132_v58 }
 0x3de   :  { %1152 = vmatpush.msra.mxu2 %v2136_v60 }
 0x3e0   :  { %1153 = vmatpush.msra.mxu2 %v2140_v2 }
 0x3e2   :  { %1154 = vmatpush.msra.mxu2 %v2144_v8 }
 0x441   :  { %v902_v2 = vpop.f32.mrf.mxu0 }
 0x442   :  { %v951_v15 = vadd.f32 %v2193_v28, %v902_v2 }
 0x444   :  { %v953_v11 = vrot.slane %v951_v15, 6 }
 0x446   :  { %v862_v53 = vpop.f32.mrf.mxu2  ;;  %v882_v59 = vpop.f32.mrf.mxu3 }
 0x447   :  { %v906_v39 = vrot.slane %v862_v53, 6  ;;  %v929_v49 = vrot.slane %v882_v59, 6 }
 0x449   :  { %v908_v24 = vadd.f32 %v906_v39, %v2303_v4  ;;  %v931_v18 = vadd.f32 %v929_v49, %v2302_v16 }
 0x44b   :  { %v1248_v52 = vmul.f32 -1.442695, %v908_v24  ;;  %v1249_v55 = vmul.f32 -1.442695, %v931_v18 }
 0x44d   :  { %1312 = vpow2.f32 %v1248_v52 }
 0x44e   :  { %1314 = vpow2.f32 %v1249_v55 }
 0x453   :  { %v1313_v43 = vpop.eup %1312 }
 0x454   :  { %v1315_v62 = vpop.eup %1314  ;;  %v912_v54 = vadd.f32 1.0, %v1313_v43 }
 0x455   :  { %v935_v63 = vadd.f32 1.0, %v1315_v62 }
 0x456   :  { %1316 = vrcp.f32 %v912_v54  ;;  %v924_v23 = vand.u32 2147483648, %v912_v54  ;;  %v922_v35 = vand.u32 2147483647, %v912_v54  ;;  %vm918_vm10 = vweird.f32 %v912_v54 }
 0x457   :  { %1318 = vrcp.f32 %v935_v63  ;;  %v947_v38 = vand.u32 2147483648, %v935_v63  ;;  %vm941_vm14 = vweird.f32 %v935_v63  ;;  %v945_v40 = vand.u32 2147483647, %v935_v63 }
 0x458   :  { %v925_v19 = vor.u32 1.1754944e-38, %v924_v23  ;;  %vm923_vm12 = vcmp.eq.f32.partialorder %v922_v35, 8.507059e+37 }
 0x459   :  { %v948_v48 = vor.u32 1.1754944e-38, %v947_v38  ;;  %vm946_vm0 = vcmp.eq.f32.partialorder %v945_v40, 8.507059e+37 }
 0x45c   :  { %v1317_v21 = vpop.eup %1316 }
 0x45d   :  { %v1319_v58 = vpop.eup %1318  ;;  %v914_v60 = vmul.f32 %v1317_v21, %v912_v54  ;;  %vm919_vm9 = vweird.f32 %v1317_v21 }
 0x45e   :  { %v937_v8 = vmul.f32 %v1319_v58, %v935_v63  ;;  %vm920_vm11 = vmor %vm918_vm10, %vm919_vm9  ;;  %vm942_vm13 = vweird.f32 %v1319_v58 }
 0x45f   :  { %v915_v10 = vsub.f32 1.0, %v914_v60  ;;  %vm943_vm15 = vmor %vm941_vm14, %vm942_vm13 }
 0x460   :  { %v938_v41 = vsub.f32 1.0, %v937_v8 }
 0x461   :  { %v916_v33 = vmul.f32 %v1317_v21, %v915_v10 }
 0x462   :  { %v939_v3 = vmul.f32 %v1319_v58, %v938_v41 }
 0x463   :  { %v917_v44 = vadd.f32 %v1317_v21, %v916_v33 }
 0x464   :  { %v940_v30 = vadd.f32 %v1319_v58, %v939_v3 }
 0x465   :  { %v921_v20 = vsel %vm920_vm11, %v1317_v21, %v917_v44 }
 0x466   :  { %v926_v26 = vsel %vm923_vm12, %v925_v19, %v921_v20  ;;  %v944_v47 = vsel %vm943_vm15, %v1319_v58, %v940_v30 }
 0x467   :  { %v955_v36 = vmul.f32 %v953_v11, %v926_v26  ;;  %v949_v51 = vsel %vm946_vm0, %v948_v48, %v944_v47 }
 0x468   :  { %v958_v22 = vsub.f32 1.0, %v949_v51  ;;  %v963_v32 = vmul.f32 %v961_v25, %v949_v51 }
 0x469   :  { %v956_v42 = vadd.f32 %v955_v36, %v2154_v7 }
 0x46b   :  { %1320 = vtanh.f32 %v956_v42 }
 0x471   :  { %v1321_v27 = vpop.eup %1320 }
 0x472   :  { %v959_v29 = vmul.f32 %v1321_v27, %v958_v22 }
 0x474   :  { %v964_v1 = vadd.f32 %v963_v32, %v959_v29 }
 0x476   :  { %v965_v5 = vsub.f32 %v964_v1, %v961_v25 }
 0x478   :  { %v966_v14 = vmul.f32 %v965_v5, %v2159_v9 }
 0x47a   :  { %v968_v17 = vrot.slane %v966_v14, 2 }
 0x47c   :  { %v2200_v37 = vadd.f32 %v968_v17, %v2163_v6 }
 0x47e   :  { %971 = vst [vmem:[%s2241_s6 + $0xa] sm:$0x3] %v2200_v37  ;;  %988 = vmatmul.f32.vlgmr.msrb.gmra.mxu1 %v2200_v37  ;;  %1008 = vmatmul.f32.vlgmr.msrb.gmra.mxu2 %v2200_v37  ;;  %v1088_v11 = vrot.slane %v2200_v37, 4 }
 0x47f   :  { %1028 = vmatmul.f32.vlgmr.msrb.gmra.mxu3 %v2200_v37 }
 0x4fb   :  { %v989_v45 = vpop.f32.mrf.mxu1 }
 0x4fc   :  { %v1033_v13 = vrot.slane %v989_v45, 4 }
 0x4fe   :  { %v1035_v34 = vadd.f32 %v1033_v13, %v2303_v4 }
 0x500   :  { %v1250_v0 = vmul.f32 -1.442695, %v1035_v34 }
 0x501   :  { %v1009_v61 = vpop.f32.mrf.mxu2 }
 0x502   :  { %1322 = vpow2.f32 %v1250_v0  ;;  %v1056_v50 = vrot.slane %v1009_v61, 4  ;;  %v1029_v39 = vpop.f32.mrf.mxu3 }
 0x503   :  { %v1078_v55 = vadd.f32 %v2193_v28, %v1029_v39 }
 0x504   :  { %v1058_v46 = vadd.f32 %v1056_v50, %v2302_v16 }
 0x505   :  { %v1080_v60 = vrot.slane %v1078_v55, 4 }
 0x506   :  { %v1251_v57 = vmul.f32 -1.442695, %v1058_v46 }
 0x508   :  { %v1323_v56 = vpop.eup %1322  ;;  %1324 = vpow2.f32 %v1251_v57 }
 0x509   :  { %v1039_v31 = vadd.f32 1.0, %v1323_v56 }
 0x50b   :  { %1326 = vrcp.f32 %v1039_v31  ;;  %v1051_v24 = vand.u32 2147483648, %v1039_v31  ;;  %v1049_v52 = vand.u32 2147483647, %v1039_v31  ;;  %vm1045_vm2 = vweird.f32 %v1039_v31 }
 0x50d   :  { %v1052_v63 = vor.u32 1.1754944e-38, %v1051_v24  ;;  %vm1050_vm4 = vcmp.eq.f32.partialorder %v1049_v52, 8.507059e+37 }
 0x50e   :  { %v1325_v12 = vpop.eup %1324 }
 0x50f   :  { %v1062_v6 = vadd.f32 1.0, %v1325_v12 }
 0x511   :  { %v1327_v53 = vpop.eup %1326  ;;  %1328 = vrcp.f32 %v1062_v6  ;;  %v1074_v10 = vand.u32 2147483648, %v1062_v6  ;;  %v1072_v41 = vand.u32 2147483647, %v1062_v6  ;;  %vm1068_vm6 = vweird.f32 %v1062_v6 }
 0x512   :  { %v1041_v59 = vmul.f32 %v1327_v53, %v1039_v31  ;;  %vm1046_vm1 = vweird.f32 %v1327_v53 }
 0x513   :  { %vm1047_vm3 = vmor %vm1045_vm2, %vm1046_vm1  ;;  %v1075_v35 = vor.u32 1.1754944e-38, %v1074_v10  ;;  %vm1073_vm8 = vcmp.eq.f32.partialorder %v1072_v41, 8.507059e+37 }
 0x514   :  { %v1042_v49 = vsub.f32 1.0, %v1041_v59 }
 0x516   :  { %v1043_v18 = vmul.f32 %v1327_v53, %v1042_v49 }
 0x517   :  { %v1329_v43 = vpop.eup %1328 }
 0x518   :  { %v1064_v62 = vmul.f32 %v1329_v43, %v1062_v6  ;;  %v1044_v54 = vadd.f32 %v1327_v53, %v1043_v18  ;;  %vm1069_vm5 = vweird.f32 %v1329_v43 }
 0x519   :  { %vm1070_vm7 = vmor %vm1068_vm6, %vm1069_vm5 }
 0x51a   :  { %v1065_v21 = vsub.f32 1.0, %v1064_v62  ;;  %v1048_v58 = vsel %vm1047_vm3, %v1327_v53, %v1044_v54 }
 0x51b   :  { %v1053_v2 = vsel %vm1050_vm4, %v1052_v63, %v1048_v58 }
 0x51c   :  { %v1066_v8 = vmul.f32 %v1329_v43, %v1065_v21  ;;  %v1082_v23 = vmul.f32 %v1080_v60, %v1053_v2 }
 0x51e   :  { %v1067_v15 = vadd.f32 %v1329_v43, %v1066_v8  ;;  %v1083_v33 = vadd.f32 %v1082_v23, %v2154_v7 }
 0x520   :  { %v1071_v3 = vsel %vm1070_vm7, %v1329_v43, %v1067_v15  ;;  %1330 = vtanh.f32 %v1083_v33 }
 0x521   :  { %v1076_v44 = vsel %vm1073_vm8, %v1075_v35, %v1071_v3 }
 0x522   :  { %v1085_v19 = vsub.f32 1.0, %v1076_v44  ;;  %v1090_v30 = vmul.f32 %v1088_v11, %v1076_v44 }
 0x526   :  { %v1331_v20 = vpop.eup %1330 }
 0x527   :  { %v1086_v26 = vmul.f32 %v1331_v20, %v1085_v19 }
 0x529   :  { %v1091_v36 = vadd.f32 %v1090_v30, %v1086_v26 }
 0x52b   :  { %v1092_v38 = vsub.f32 %v1091_v36, %v1088_v11 }
 0x52d   :  { %v1093_v40 = vmul.f32 %v1092_v38, %v2159_v9 }
 0x52f   :  { %v1095_v42 = vrot.slane %v1093_v40, 4 }
 0x531   :  { %v2216_v47 = vadd.f32 %v1095_v42, %v2200_v37 }
 0x533   :  { %1098 = vst [vmem:[%s2241_s6 + $0xc] sm:$0x3] %v2216_v47  ;;  %1115 = vmatmul.f32.vlgmr.msra.gmra.mxu0 %v2216_v47  ;;  %1135 = vmatmul.f32.vlgmr.msra.gmra.mxu1 %v2216_v47  ;;  %v1215_v63 = vrot.slane %v2216_v47, 2 }
 0x534   :  { %1155 = vmatmul.f32.vlgmr.msra.gmra.mxu2 %v2216_v47 }
 0x5b0   :  { %v1116_v48 = vpop.f32.mrf.mxu0  ;;  %v1136_v51 = vpop.f32.mrf.mxu1 }
 0x5b1   :  { %v1160_v22 = vrot.slane %v1116_v48, 2  ;;  %v1183_v25 = vrot.slane %v1136_v51, 2 }
 0x5b3   :  { %v1162_v27 = vadd.f32 %v1160_v22, %v2303_v4  ;;  %v1185_v29 = vadd.f32 %v1183_v25, %v2302_v16 }
 0x5b5   :  { %v1252_v32 = vmul.f32 -1.442695, %v1162_v27  ;;  %v1253_v1 = vmul.f32 -1.442695, %v1185_v29 }
 0x5b7   :  { %1332 = vpow2.f32 %v1252_v32  ;;  %v1156_v61 = vpop.f32.mrf.mxu2 }
 0x5b8   :  { %1334 = vpow2.f32 %v1253_v1  ;;  %v1205_v56 = vadd.f32 %v2193_v28, %v1156_v61 }
 0x5ba   :  { %v1207_v59 = vrot.slane %v1205_v56, 2 }
 0x5bd   :  { %v1333_v5 = vpop.eup %1332 }
 0x5be   :  { %v1335_v14 = vpop.eup %1334  ;;  %v1166_v17 = vadd.f32 1.0, %v1333_v5 }
 0x5bf   :  { %v1189_v37 = vadd.f32 1.0, %v1335_v14 }
 0x5c0   :  { %1336 = vrcp.f32 %v1166_v17  ;;  %v1178_v4 = vand.u32 2147483648, %v1166_v17  ;;  %v1176_v16 = vand.u32 2147483647, %v1166_v17  ;;  %vm1172_vm10 = vweird.f32 %v1166_v17 }
 0x5c1   :  { %1338 = vrcp.f32 %v1189_v37  ;;  %v1201_v24 = vand.u32 2147483648, %v1189_v37  ;;  %vm1195_vm14 = vweird.f32 %v1189_v37  ;;  %v1199_v52 = vand.u32 2147483647, %v1189_v37 }
 0x5c2   :  { %v1179_v6 = vor.u32 1.1754944e-38, %v1178_v4  ;;  %vm1177_vm12 = vcmp.eq.f32.partialorder %v1176_v16, 8.507059e+37 }
 0x5c3   :  { %v1202_v28 = vor.u32 1.1754944e-38, %v1201_v24  ;;  %vm1200_vm0 = vcmp.eq.f32.partialorder %v1199_v52, 8.507059e+37 }
 0x5c6   :  { %v1337_v45 = vpop.eup %1336 }
 0x5c7   :  { %v1339_v13 = vpop.eup %1338  ;;  %v1168_v34 = vmul.f32 %v1337_v45, %v1166_v17  ;;  %vm1173_vm9 = vweird.f32 %v1337_v45 }
 0x5c8   :  { %v1191_v0 = vmul.f32 %v1339_v13, %v1189_v37  ;;  %vm1174_vm11 = vmor %vm1172_vm10, %vm1173_vm9  ;;  %vm1196_vm13 = vweird.f32 %v1339_v13 }
 0x5c9   :  { %v1169_v50 = vsub.f32 1.0, %v1168_v34  ;;  %vm1197_vm15 = vmor %vm1195_vm14, %vm1196_vm13 }
 0x5ca   :  { %v1192_v46 = vsub.f32 1.0, %v1191_v0 }
 0x5cb   :  { %v1170_v57 = vmul.f32 %v1337_v45, %v1169_v50 }
 0x5cc   :  { %v1193_v31 = vmul.f32 %v1339_v13, %v1192_v46 }
 0x5cd   :  { %v1171_v12 = vadd.f32 %v1337_v45, %v1170_v57 }
 0x5ce   :  { %v1194_v39 = vadd.f32 %v1339_v13, %v1193_v31 }
 0x5cf   :  { %v1175_v53 = vsel %vm1174_vm11, %v1337_v45, %v1171_v12 }
 0x5d0   :  { %v1180_v49 = vsel %vm1177_vm12, %v1179_v6, %v1175_v53  ;;  %v1198_v43 = vsel %vm1197_vm15, %v1339_v13, %v1194_v39 }
 0x5d1   :  { %v1209_v18 = vmul.f32 %v1207_v59, %v1180_v49  ;;  %v1203_v62 = vsel %vm1200_vm0, %v1202_v28, %v1198_v43 }
 0x5d2   :  { %v1212_v54 = vsub.f32 1.0, %v1203_v62  ;;  %v1217_v60 = vmul.f32 %v1215_v63, %v1203_v62 }
 0x5d3   :  { %v1210_v55 = vadd.f32 %v1209_v18, %v2154_v7 }
 0x5d5   :  { %1340 = vtanh.f32 %v1210_v55 }
 0x5db   :  { %v1341_v21 = vpop.eup %1340 }
 0x5dc   :  { %v1213_v58 = vmul.f32 %v1341_v21, %v1212_v54 }
 0x5de   :  { %v1218_v2 = vadd.f32 %v1217_v60, %v1213_v58 }
 0x5e0   :  { %v1219_v8 = vsub.f32 %v1218_v2, %v1215_v63 }
 0x5e2   :  { %v1220_v10 = vmul.f32 %v1219_v8, %v2159_v9 }
 0x5e4   :  { %v1222_v23 = vrot.slane %v1220_v10, 6 }
 0x5e6   :  { %v1224_v41 = vadd.f32 %v1222_v23, %v2216_v47 }
 0x5e8   :  { %1225 = vst [vmem:[%s2241_s6 + $0xe] sm:$0x3] %v1224_v41 }
 0x5e9   :  { %1230 = vsyncpa [#allocation3], 1 }
 0x5ea   :  { %1231 = vsyncpa [#allocation5], 1 }

</bundles_post_ra>
